<compile_context>
chip_gen: v7x
topology: tpu7x:2x2x1
jax: 0.10.0
libtpu: 0.0.40
codegen_flags: <defaults>
</compile_context>

<pallas_src>
import functools

import jax
import jax.numpy as jnp
from jax.experimental import pallas as pl
from jax.experimental.pallas import tpu as pltpu

# dtype of the MXU operands (tap-stacked activations + weights).  Everything elementwise
# (bias add, ELU, masks, layer chaining) stays float32.  Set to jnp.float32 for bit-closer
# numerics at the cost of VMEM / MXU rate.
_MXU_DTYPE = jnp.bfloat16
_LANE = 128


def _elu(x):
    # PyTorch nn.ELU (alpha=1.0).  exp lowers to the EUP slot; min() keeps the discarded
    # positive branch from overflowing.
    return jnp.where(x > 0.0, x, jnp.exp(jnp.minimum(x, 0.0)) - 1.0)


def _tcn_fused_kernel(x_ref, w1_ref, b1_ref, w2_ref, b2_ref, *rest,
                      kernel_size, dilations, valid_len, n_out):
    """All TCN layers fused; one (C, Tp) batch slab per grid step, fully VMEM resident.

    x_ref : (C, Tp)       float32   one batch element (Tp = T rounded up to 128)
    w*_ref: (L, C, K*C)   bf16      weight-normalized, tap-stacked conv weights
    b*_ref: (L, C, 1)     float32
    rest  : n_out output refs, each (C, Tp) float32, then the (K*C, Tp) tap scratch.
    """
    out_refs = rest[:n_out]
    xs_ref = rest[n_out]

    K = kernel_size
    L = len(dilations)
    C, Tp = x_ref.shape
    T = valid_len

    # Lane position along (padded) time.  One iota, reused by every tap mask.
    t_pos = jax.lax.broadcasted_iota(jnp.int32, (C, Tp), 1)

    def conv(inp, w_stacked, b, offsets, masks):
        # Stage the K dilated taps into the persistent (K*C, Tp) scratch so the whole
        # conv is ONE MXU matmul with contraction depth K*C (not K tiny dots + adds).
        for k, off in enumerate(offsets):                 # static taps
            if off == 0:
                piece = inp
            else:
                # shifted[:, t] = inp[:, (t + off) mod Tp]; wrapped / zero-pad lanes are
                # removed by the per-layer mask.
                shifted = jnp.roll(inp, shift=-off, axis=1)
                piece = jnp.where(masks[off], shifted, 0.0)
            xs_ref[pl.ds(k * C, C), :] = piece.astype(xs_ref.dtype)
        y = jnp.dot(w_stacked, xs_ref[...], preferred_element_type=jnp.float32)
        return y + b

    h = x_ref[...]
    for l, d in enumerate(dilations):                     # static layer loop / dilations
        pad = (K - 1) * d // 2
        offsets = tuple(k * d - pad for k in range(K))

        # Tap validity: output position t reads input position t+off, valid iff
        # 0 <= t+off < T.  This zeroes both the "same"-conv zero-padding region and any
        # lanes that wrapped or fell into the T..Tp lane pad.  Built once per layer
        # (1 compare for off>0, <=2 for off<0) and shared by conv1 and conv2.
        masks = {}
        for off in offsets:
            if off == 0:
                continue
            if off > 0:
                masks[off] = t_pos < T - off
            else:
                m = t_pos >= -off
                if T - off < Tp:
                    m = jnp.logical_and(m, t_pos < T - off)
                masks[off] = m

        y = _elu(conv(h, w1_ref[l], b1_ref[l], offsets, masks))   # conv1 -> elu1
        # dropout1: identity at inference.
        y = _elu(conv(y, w2_ref[l], b2_ref[l], offsets, masks))   # conv2 -> elu2
        # dropout2: identity.  The downsample residual only exists when in_ch != out_ch,
        # which is unreachable (conv2 channel quirk), so elu3 is applied with NO residual.
        y = _elu(y)                                               # elu3
        if l >= L - n_out:                       # only emit the layers that are consumed
            out_refs[l - (L - n_out)][...] = y.astype(out_refs[0].dtype)
        h = y


@functools.lru_cache(maxsize=None)
def _make_forward_fn(B, C, T, L, K, dilations, n_out):
    assert K % 2 == 1, "even kernel_size does not reproduce PyTorch Conv1d 'same' alignment"
    Tp = pl.cdiv(T, _LANE) * _LANE               # lane-dense time extent

    kernel = functools.partial(_tcn_fused_kernel, kernel_size=K, dilations=dilations,
                               valid_len=T, n_out=n_out)

    # VMEM budget (bytes).  Default scoped limits (16 MiB v5e / 32 MiB v6e,v7x) are raised
    # explicitly; clamped to v7x's 64 MiB physical VMEM.
    est = (2 * C * Tp * 4                        # input block, double-buffered
           + 2 * n_out * C * Tp * 4              # output blocks, double-buffered
           + 2 * 2 * L * C * (K * C) * 2         # w1, w2 (bf16), double-buffered
           + 2 * 2 * L * C * _LANE * 4           # b1, b2 (lane-padded), double-buffered
           + K * C * Tp * 2                      # tap-stack scratch (bf16)
           + 8 * C * Tp * 4)                     # live f32 temporaries (h, y, shifts)
    vmem_limit = min(max(2 * est, 32 * 1024 * 1024), 64 * 1024 * 1024)
    # TODO(synk): for very long T where 2*est exceeds ~48 MiB, tile the time axis with a
    # (K-1)*max(dilations)//2 halo instead of one resident slab per batch element.

    fused = pl.pallas_call(
        kernel,
        grid=(B,),
        in_specs=[
            pl.BlockSpec((None, C, Tp), lambda b: (b, 0, 0)),     # x: one batch slab
            pl.BlockSpec((L, C, K * C), lambda b: (0, 0, 0)),     # w1 (fetched once)
            pl.BlockSpec((L, C, 1), lambda b: (0, 0, 0)),         # b1
            pl.BlockSpec((L, C, K * C), lambda b: (0, 0, 0)),     # w2
            pl.BlockSpec((L, C, 1), lambda b: (0, 0, 0)),         # b2
        ],
        out_specs=tuple(pl.BlockSpec((None, C, Tp), lambda b: (b, 0, 0))
                        for _ in range(n_out)),
        out_shape=tuple(jax.ShapeDtypeStruct((B, C, Tp), jnp.float32)
                        for _ in range(n_out)),
        scratch_shapes=[pltpu.VMEM((K * C, Tp), _MXU_DTYPE)],
        compiler_params=pltpu.CompilerParams(
            dimension_semantics=("parallel",),   # batch axis: megacore / v7x 2nd TC
            vmem_limit_bytes=vmem_limit),
    )

    def run(x, w1, b1, w2, b2):
        if Tp != T:                               # pad time up to a multiple of 128
            x = jnp.pad(x, ((0, 0), (0, 0), (0, Tp - T)))
        outs = fused(x, w1, b1, w2, b2)           # n_out arrays of (B, C, Tp)
        return [o[:, :, :T] for o in outs]        # each (B, C, T); layout already right

    return jax.jit(run)


# ----------------------------- parameter setup (plain JAX glue) -----------------------------

def _weight_norm(v, g):
    # torch.nn.utils.weight_norm with dim=0: W = g * V / ||V||_(per out-channel)
    norm = jnp.sqrt(jnp.sum(v * v, axis=(1, 2), keepdims=True))
    return v * (g[:, None, None] / norm)


def init_layer_params(key, c_in, c_out, kernel_size):
    ks = jax.random.split(key, 6)
    v1 = 0.01 * jax.random.normal(ks[0], (c_out, c_in, kernel_size), jnp.float32)
    g1 = 1.0 + 0.1 * jax.random.normal(ks[1], (c_out,), jnp.float32)
    b1 = 0.01 * jax.random.normal(ks[2], (c_out,), jnp.float32)
    v2 = 0.01 * jax.random.normal(ks[3], (c_out, c_in, kernel_size), jnp.float32)
    g2 = 1.0 + 0.1 * jax.random.normal(ks[4], (c_out,), jnp.float32)
    b2 = 0.01 * jax.random.normal(ks[5], (c_out,), jnp.float32)
    return {
        "w1": _weight_norm(v1, g1),   # (C_out, C_in, K) -- nn.Conv1d.weight layout
        "b1": b1,                     # (C_out,)
        "w2": _weight_norm(v2, g2),
        "b2": b2,
    }


def prepare_tcn_params(layer_params, kernel_size):
    """One-time prep: tap-stack each conv weight, cast to the MXU dtype, and stack all
    layers, so no per-forward transposes or bias reshapes remain on the hot path."""
    w1s, b1s, w2s, b2s = [], [], [], []
    for p in layer_params:
        c_out, c_in, K = p["w1"].shape
        assert K == kernel_size
        # (C_out, C_in, K) -> (C_out, K, C_in) -> (C_out, K*C_in);
        # column k*C_in + ci holds W[:, ci, k], matching the in-kernel tap stacking.
        w1s.append(jnp.transpose(p["w1"], (0, 2, 1)).reshape(c_out, K * c_in))
        w2s.append(jnp.transpose(p["w2"], (0, 2, 1)).reshape(c_out, K * c_in))
        b1s.append(p["b1"][:, None])
        b2s.append(p["b2"][:, None])
    return {
        "w1": jnp.stack(w1s).astype(_MXU_DTYPE),   # (L, C, K*C)
        "b1": jnp.stack(b1s),                      # (L, C, 1) f32
        "w2": jnp.stack(w2s).astype(_MXU_DTYPE),
        "b2": jnp.stack(b2s),
        "dilations": tuple(2 ** i for i in range(len(layer_params))),
        "kernel_size": kernel_size,
    }


def tcn_forward(prepared, x, number_of_backbone_layers=None,
                base_image_level_from_top=None):
    """Mirrors NonCausalTemporalConvolutionalNetwork.forward: returns (results, base_shape)."""
    B, C, T = x.shape
    L = prepared["w1"].shape[0]
    K = prepared["kernel_size"]

    last_count = 1 if number_of_backbone_layers is None else number_of_backbone_layers
    n_out = min(max(last_count, 1), L)            # layers actually emitted by the kernel

    run = _make_forward_fn(B, C, T, L, K, prepared["dilations"], n_out)
    outs = run(x, prepared["w1"], prepared["b1"], prepared["w2"], prepared["b2"])

    results = list(outs) if last_count >= 1 else []

    # Every layer's output has shape (B, C, T) (in_ch == out_ch quirk), so the FPN base
    # shape is known without materializing that layer.
    base_level_image_shape = None
    if base_image_level_from_top is not None and 0 <= base_image_level_from_top <= L - 1:
        base_level_image_shape = (B, C, T)
    return results, base_level_image_shape


if __name__ == "__main__":
    key = jax.random.PRNGKey(0)

    inputs = 16
    channels = [16, 16, 16]   # must equal `inputs` (conv2 channel quirk in the PyTorch source)
    kernel_size = 5
    B, T = 2, 128

    kx, *klayers = jax.random.split(key, 1 + len(channels))

    params = []
    c_prev = inputs
    for i, c in enumerate(channels):
        assert c_prev == c, "forward only runnable when in_ch == out_ch (matches PyTorch)"
        params.append(init_layer_params(klayers[i], c_prev, c, kernel_size))
        c_prev = c

    prepared = prepare_tcn_params(params, kernel_size)
    x = jax.random.normal(kx, (B, inputs, T), jnp.float32)

    results, base_shape = tcn_forward(prepared, x)
    jax.block_until_ready(results)

    assert len(results) == 1
    assert results[0].shape == (B, channels[-1], T)
    assert results[0].dtype == jnp.float32
    assert base_shape is None
    print("KERNEL_OK")
</pallas_src>

<mosaic_0001>
module attributes {stable_mosaic.version = 11 : i64} {
  func.func @_tcn_fused_kernel(%arg0: i32, %arg1: memref<1x16x128xf32, #tpu.memory_space<vmem>>, %arg2: memref<3x16x80xbf16, #tpu.memory_space<vmem>>, %arg3: memref<3x16x1xf32, #tpu.memory_space<vmem>>, %arg4: memref<3x16x80xbf16, #tpu.memory_space<vmem>>, %arg5: memref<3x16x1xf32, #tpu.memory_space<vmem>>, %arg6: memref<1x16x128xf32, #tpu.memory_space<vmem>>, %arg7: memref<80x128xbf16, #tpu.memory_space<vmem>>) attributes {dimension_semantics = [#tpu.dimension_semantics<parallel>], iteration_bounds = array<i64: 2>, scalar_prefetch = 0 : i64, scratch_operands = 1 : i64, tpu.core_type = #tpu.core_type<tc>, window_params = [{transform_indices = @transform_0, window_bounds = array<i64: 1, 16, 128>}, {pipeline_mode = #tpu.pipeline_mode<synchronous>, transform_indices = @transform_1, window_bounds = array<i64: 3, 16, 80>}, {pipeline_mode = #tpu.pipeline_mode<synchronous>, transform_indices = @transform_2, window_bounds = array<i64: 3, 16, 1>}, {pipeline_mode = #tpu.pipeline_mode<synchronous>, transform_indices = @transform_3, window_bounds = array<i64: 3, 16, 80>}, {pipeline_mode = #tpu.pipeline_mode<synchronous>, transform_indices = @transform_4, window_bounds = array<i64: 3, 16, 1>}, {transform_indices = @transform_5, window_bounds = array<i64: 1, 16, 128>}]} {
    %0 = tpu.iota {dimensions = array<i32: 1>} : vector<16x128xi32>
    %c0 = arith.constant 0 : index
    %c0_0 = arith.constant 0 : index
    %c0_1 = arith.constant 0 : index
    %1 = vector.load %arg1[%c0, %c0_0, %c0_1] : memref<1x16x128xf32, #tpu.memory_space<vmem>>, vector<1x16x128xf32>
    %2 = vector.shape_cast %1 : vector<1x16x128xf32> to vector<16x128xf32>
    %c2_i32 = arith.constant 2 : i32
    %3 = vector.broadcast %c2_i32 : i32 to vector<16x128xi32>
    %4 = arith.cmpi sge, %0, %3 : vector<16x128xi32>
    %c1_i32 = arith.constant 1 : i32
    %5 = vector.broadcast %c1_i32 : i32 to vector<16x128xi32>
    %6 = arith.cmpi sge, %0, %5 : vector<16x128xi32>
    %c127_i32 = arith.constant 127 : i32
    %7 = vector.broadcast %c127_i32 : i32 to vector<16x128xi32>
    %8 = arith.cmpi slt, %0, %7 : vector<16x128xi32>
    %c126_i32 = arith.constant 126 : i32
    %9 = vector.broadcast %c126_i32 : i32 to vector<16x128xi32>
    %10 = arith.cmpi slt, %0, %9 : vector<16x128xi32>
    %c0_2 = arith.constant 0 : index
    %c0_3 = arith.constant 0 : index
    %c0_4 = arith.constant 0 : index
    %11 = vector.load %arg2[%c0_2, %c0_3, %c0_4] : memref<3x16x80xbf16, #tpu.memory_space<vmem>>, vector<1x16x80xbf16>
    %12 = vector.shape_cast %11 : vector<1x16x80xbf16> to vector<16x80xbf16>
    %c0_5 = arith.constant 0 : index
    %c0_6 = arith.constant 0 : index
    %c0_7 = arith.constant 0 : index
    %13 = vector.load %arg3[%c0_5, %c0_6, %c0_7] : memref<3x16x1xf32, #tpu.memory_space<vmem>>, vector<1x16x1xf32>
    %14 = vector.shape_cast %13 : vector<1x16x1xf32> to vector<16x1xf32>
    %15 = vector.extract_strided_slice %2 {offsets = [0, 126], sizes = [16, 2], strides = [1, 1]} : vector<16x128xf32> to vector<16x2xf32>
    %16 = vector.extract_strided_slice %2 {offsets = [0, 0], sizes = [16, 126], strides = [1, 1]} : vector<16x128xf32> to vector<16x126xf32>
    %17 = tpu.concatenate %15, %16 in 1 : vector<16x2xf32>, vector<16x126xf32> -> vector<16x128xf32>
    %cst = arith.constant 0.000000e+00 : f32
    %18 = vector.broadcast %cst : f32 to vector<16x128xf32>
    %19 = arith.select %4, %17, %18 : vector<16x128xi1>, vector<16x128xf32>
    %20 = arith.truncf %19 : vector<16x128xf32> to vector<16x128xbf16>
    %c0_8 = arith.constant 0 : index
    %c0_9 = arith.constant 0 : index
    %21 = vector.load %arg7[%c0_8, %c0_9] : memref<80x128xbf16, #tpu.memory_space<vmem>>, vector<16x128xbf16>
    tpu.vector_store %arg7[%c0_8, %c0_9], %20 {strides = array<i32>} : memref<80x128xbf16, #tpu.memory_space<vmem>>, vector<16x128xbf16>,
    %22 = vector.extract_strided_slice %2 {offsets = [0, 127], sizes = [16, 1], strides = [1, 1]} : vector<16x128xf32> to vector<16x1xf32>
    %23 = vector.extract_strided_slice %2 {offsets = [0, 0], sizes = [16, 127], strides = [1, 1]} : vector<16x128xf32> to vector<16x127xf32>
    %24 = tpu.concatenate %22, %23 in 1 : vector<16x1xf32>, vector<16x127xf32> -> vector<16x128xf32>
    %cst_10 = arith.constant 0.000000e+00 : f32
    %25 = vector.broadcast %cst_10 : f32 to vector<16x128xf32>
    %26 = arith.select %6, %24, %25 : vector<16x128xi1>, vector<16x128xf32>
    %27 = arith.truncf %26 : vector<16x128xf32> to vector<16x128xbf16>
    %c16 = arith.constant 16 : index
    %c0_11 = arith.constant 0 : index
    %28 = vector.load %arg7[%c16, %c0_11] : memref<80x128xbf16, #tpu.memory_space<vmem>>, vector<16x128xbf16>
    tpu.vector_store %arg7[%c16, %c0_11], %27 {strides = array<i32>} : memref<80x128xbf16, #tpu.memory_space<vmem>>, vector<16x128xbf16>,
    %29 = arith.truncf %2 : vector<16x128xf32> to vector<16x128xbf16>
    %c32 = arith.constant 32 : index
    %c0_12 = arith.constant 0 : index
    %30 = vector.load %arg7[%c32, %c0_12] : memref<80x128xbf16, #tpu.memory_space<vmem>>, vector<16x128xbf16>
    tpu.vector_store %arg7[%c32, %c0_12], %29 {strides = array<i32>} : memref<80x128xbf16, #tpu.memory_space<vmem>>, vector<16x128xbf16>,
    %31 = vector.extract_strided_slice %2 {offsets = [0, 1], sizes = [16, 127], strides = [1, 1]} : vector<16x128xf32> to vector<16x127xf32>
    %32 = vector.extract_strided_slice %2 {offsets = [0, 0], sizes = [16, 1], strides = [1, 1]} : vector<16x128xf32> to vector<16x1xf32>
    %33 = tpu.concatenate %31, %32 in 1 : vector<16x127xf32>, vector<16x1xf32> -> vector<16x128xf32>
    %cst_13 = arith.constant 0.000000e+00 : f32
    %34 = vector.broadcast %cst_13 : f32 to vector<16x128xf32>
    %35 = arith.select %8, %33, %34 : vector<16x128xi1>, vector<16x128xf32>
    %36 = arith.truncf %35 : vector<16x128xf32> to vector<16x128xbf16>
    %c48 = arith.constant 48 : index
    %c0_14 = arith.constant 0 : index
    %37 = vector.load %arg7[%c48, %c0_14] : memref<80x128xbf16, #tpu.memory_space<vmem>>, vector<16x128xbf16>
    tpu.vector_store %arg7[%c48, %c0_14], %36 {strides = array<i32>} : memref<80x128xbf16, #tpu.memory_space<vmem>>, vector<16x128xbf16>,
    %38 = vector.extract_strided_slice %2 {offsets = [0, 2], sizes = [16, 126], strides = [1, 1]} : vector<16x128xf32> to vector<16x126xf32>
    %39 = vector.extract_strided_slice %2 {offsets = [0, 0], sizes = [16, 2], strides = [1, 1]} : vector<16x128xf32> to vector<16x2xf32>
    %40 = tpu.concatenate %38, %39 in 1 : vector<16x126xf32>, vector<16x2xf32> -> vector<16x128xf32>
    %cst_15 = arith.constant 0.000000e+00 : f32
    %41 = vector.broadcast %cst_15 : f32 to vector<16x128xf32>
    %42 = arith.select %10, %40, %41 : vector<16x128xi1>, vector<16x128xf32>
    %43 = arith.truncf %42 : vector<16x128xf32> to vector<16x128xbf16>
    %c64 = arith.constant 64 : index
    %c0_16 = arith.constant 0 : index
    %44 = vector.load %arg7[%c64, %c0_16] : memref<80x128xbf16, #tpu.memory_space<vmem>>, vector<16x128xbf16>
    tpu.vector_store %arg7[%c64, %c0_16], %43 {strides = array<i32>} : memref<80x128xbf16, #tpu.memory_space<vmem>>, vector<16x128xbf16>,
    %c0_17 = arith.constant 0 : index
    %c0_18 = arith.constant 0 : index
    %45 = vector.load %arg7[%c0_17, %c0_18] : memref<80x128xbf16, #tpu.memory_space<vmem>>, vector<80x128xbf16>
    %cst_19 = arith.constant dense<0.000000e+00> : vector<16x128xf32>
    %46 = tpu.matmul %12, %45, %cst_19 {dimension_numbers = #tpu.dot_dimension_numbers<[1], [0], [0], [1], [0, 0, 1, 1], [], []>} : vector<16x80xbf16>, vector<80x128xbf16>, vector<16x128xf32> -> vector<16x128xf32>
    %47 = vector.broadcast %14 : vector<16x1xf32> to vector<16x128xf32>
    %48 = arith.addf %46, %47 : vector<16x128xf32>
    %cst_20 = arith.constant 0.000000e+00 : f32
    %49 = vector.broadcast %cst_20 : f32 to vector<16x128xf32>
    %50 = arith.cmpf ogt, %48, %49 : vector<16x128xf32>
    %cst_21 = arith.constant 0.000000e+00 : f32
    %51 = vector.broadcast %cst_21 : f32 to vector<16x128xf32>
    %52 = arith.minimumf %48, %51 : vector<16x128xf32>
    %53 = math.exp %52 : vector<16x128xf32>
    %cst_22 = arith.constant 1.000000e+00 : f32
    %54 = vector.broadcast %cst_22 : f32 to vector<16x128xf32>
    %55 = arith.subf %53, %54 : vector<16x128xf32>
    %56 = arith.select %50, %48, %55 : vector<16x128xi1>, vector<16x128xf32>
    %c0_23 = arith.constant 0 : index
    %c0_24 = arith.constant 0 : index
    %c0_25 = arith.constant 0 : index
    %57 = vector.load %arg4[%c0_23, %c0_24, %c0_25] : memref<3x16x80xbf16, #tpu.memory_space<vmem>>, vector<1x16x80xbf16>
    %58 = vector.shape_cast %57 : vector<1x16x80xbf16> to vector<16x80xbf16>
    %c0_26 = arith.constant 0 : index
    %c0_27 = arith.constant 0 : index
    %c0_28 = arith.constant 0 : index
    %59 = vector.load %arg5[%c0_26, %c0_27, %c0_28] : memref<3x16x1xf32, #tpu.memory_space<vmem>>, vector<1x16x1xf32>
    %60 = vector.shape_cast %59 : vector<1x16x1xf32> to vector<16x1xf32>
    %61 = vector.extract_strided_slice %56 {offsets = [0, 126], sizes = [16, 2], strides = [1, 1]} : vector<16x128xf32> to vector<16x2xf32>
    %62 = vector.extract_strided_slice %56 {offsets = [0, 0], sizes = [16, 126], strides = [1, 1]} : vector<16x128xf32> to vector<16x126xf32>
    %63 = tpu.concatenate %61, %62 in 1 : vector<16x2xf32>, vector<16x126xf32> -> vector<16x128xf32>
    %cst_29 = arith.constant 0.000000e+00 : f32
    %64 = vector.broadcast %cst_29 : f32 to vector<16x128xf32>
    %65 = arith.select %4, %63, %64 : vector<16x128xi1>, vector<16x128xf32>
    %66 = arith.truncf %65 : vector<16x128xf32> to vector<16x128xbf16>
    %c0_30 = arith.constant 0 : index
    %c0_31 = arith.constant 0 : index
    %67 = vector.load %arg7[%c0_30, %c0_31] : memref<80x128xbf16, #tpu.memory_space<vmem>>, vector<16x128xbf16>
    tpu.vector_store %arg7[%c0_30, %c0_31], %66 {strides = array<i32>} : memref<80x128xbf16, #tpu.memory_space<vmem>>, vector<16x128xbf16>,
    %68 = vector.extract_strided_slice %56 {offsets = [0, 127], sizes = [16, 1], strides = [1, 1]} : vector<16x128xf32> to vector<16x1xf32>
    %69 = vector.extract_strided_slice %56 {offsets = [0, 0], sizes = [16, 127], strides = [1, 1]} : vector<16x128xf32> to vector<16x127xf32>
    %70 = tpu.concatenate %68, %69 in 1 : vector<16x1xf32>, vector<16x127xf32> -> vector<16x128xf32>
    %cst_32 = arith.constant 0.000000e+00 : f32
    %71 = vector.broadcast %cst_32 : f32 to vector<16x128xf32>
    %72 = arith.select %6, %70, %71 : vector<16x128xi1>, vector<16x128xf32>
    %73 = arith.truncf %72 : vector<16x128xf32> to vector<16x128xbf16>
    %c16_33 = arith.constant 16 : index
    %c0_34 = arith.constant 0 : index
    %74 = vector.load %arg7[%c16_33, %c0_34] : memref<80x128xbf16, #tpu.memory_space<vmem>>, vector<16x128xbf16>
    tpu.vector_store %arg7[%c16_33, %c0_34], %73 {strides = array<i32>} : memref<80x128xbf16, #tpu.memory_space<vmem>>, vector<16x128xbf16>,
    %75 = arith.truncf %56 : vector<16x128xf32> to vector<16x128xbf16>
    %c32_35 = arith.constant 32 : index
    %c0_36 = arith.constant 0 : index
    %76 = vector.load %arg7[%c32_35, %c0_36] : memref<80x128xbf16, #tpu.memory_space<vmem>>, vector<16x128xbf16>
    tpu.vector_store %arg7[%c32_35, %c0_36], %75 {strides = array<i32>} : memref<80x128xbf16, #tpu.memory_space<vmem>>, vector<16x128xbf16>,
    %77 = vector.extract_strided_slice %56 {offsets = [0, 1], sizes = [16, 127], strides = [1, 1]} : vector<16x128xf32> to vector<16x127xf32>
    %78 = vector.extract_strided_slice %56 {offsets = [0, 0], sizes = [16, 1], strides = [1, 1]} : vector<16x128xf32> to vector<16x1xf32>
    %79 = tpu.concatenate %77, %78 in 1 : vector<16x127xf32>, vector<16x1xf32> -> vector<16x128xf32>
    %cst_37 = arith.constant 0.000000e+00 : f32
    %80 = vector.broadcast %cst_37 : f32 to vector<16x128xf32>
    %81 = arith.select %8, %79, %80 : vector<16x128xi1>, vector<16x128xf32>
    %82 = arith.truncf %81 : vector<16x128xf32> to vector<16x128xbf16>
    %c48_38 = arith.constant 48 : index
    %c0_39 = arith.constant 0 : index
    %83 = vector.load %arg7[%c48_38, %c0_39] : memref<80x128xbf16, #tpu.memory_space<vmem>>, vector<16x128xbf16>
    tpu.vector_store %arg7[%c48_38, %c0_39], %82 {strides = array<i32>} : memref<80x128xbf16, #tpu.memory_space<vmem>>, vector<16x128xbf16>,
    %84 = vector.extract_strided_slice %56 {offsets = [0, 2], sizes = [16, 126], strides = [1, 1]} : vector<16x128xf32> to vector<16x126xf32>
    %85 = vector.extract_strided_slice %56 {offsets = [0, 0], sizes = [16, 2], strides = [1, 1]} : vector<16x128xf32> to vector<16x2xf32>
    %86 = tpu.concatenate %84, %85 in 1 : vector<16x126xf32>, vector<16x2xf32> -> vector<16x128xf32>
    %cst_40 = arith.constant 0.000000e+00 : f32
    %87 = vector.broadcast %cst_40 : f32 to vector<16x128xf32>
    %88 = arith.select %10, %86, %87 : vector<16x128xi1>, vector<16x128xf32>
    %89 = arith.truncf %88 : vector<16x128xf32> to vector<16x128xbf16>
    %c64_41 = arith.constant 64 : index
    %c0_42 = arith.constant 0 : index
    %90 = vector.load %arg7[%c64_41, %c0_42] : memref<80x128xbf16, #tpu.memory_space<vmem>>, vector<16x128xbf16>
    tpu.vector_store %arg7[%c64_41, %c0_42], %89 {strides = array<i32>} : memref<80x128xbf16, #tpu.memory_space<vmem>>, vector<16x128xbf16>,
    %c0_43 = arith.constant 0 : index
    %c0_44 = arith.constant 0 : index
    %91 = vector.load %arg7[%c0_43, %c0_44] : memref<80x128xbf16, #tpu.memory_space<vmem>>, vector<80x128xbf16>
    %cst_45 = arith.constant dense<0.000000e+00> : vector<16x128xf32>
    %92 = tpu.matmul %58, %91, %cst_45 {dimension_numbers = #tpu.dot_dimension_numbers<[1], [0], [0], [1], [0, 0, 1, 1], [], []>} : vector<16x80xbf16>, vector<80x128xbf16>, vector<16x128xf32> -> vector<16x128xf32>
    %93 = vector.broadcast %60 : vector<16x1xf32> to vector<16x128xf32>
    %94 = arith.addf %92, %93 : vector<16x128xf32>
    %cst_46 = arith.constant 0.000000e+00 : f32
    %95 = vector.broadcast %cst_46 : f32 to vector<16x128xf32>
    %96 = arith.cmpf ogt, %94, %95 : vector<16x128xf32>
    %cst_47 = arith.constant 0.000000e+00 : f32
    %97 = vector.broadcast %cst_47 : f32 to vector<16x128xf32>
    %98 = arith.minimumf %94, %97 : vector<16x128xf32>
    %99 = math.exp %98 : vector<16x128xf32>
    %cst_48 = arith.constant 1.000000e+00 : f32
    %100 = vector.broadcast %cst_48 : f32 to vector<16x128xf32>
    %101 = arith.subf %99, %100 : vector<16x128xf32>
    %102 = arith.select %96, %94, %101 : vector<16x128xi1>, vector<16x128xf32>
    %cst_49 = arith.constant 0.000000e+00 : f32
    %103 = vector.broadcast %cst_49 : f32 to vector<16x128xf32>
    %104 = arith.cmpf ogt, %102, %103 : vector<16x128xf32>
    %cst_50 = arith.constant 0.000000e+00 : f32
    %105 = vector.broadcast %cst_50 : f32 to vector<16x128xf32>
    %106 = arith.minimumf %102, %105 : vector<16x128xf32>
    %107 = math.exp %106 : vector<16x128xf32>
    %cst_51 = arith.constant 1.000000e+00 : f32
    %108 = vector.broadcast %cst_51 : f32 to vector<16x128xf32>
    %109 = arith.subf %107, %108 : vector<16x128xf32>
    %110 = arith.select %104, %102, %109 : vector<16x128xi1>, vector<16x128xf32>
    %c4_i32 = arith.constant 4 : i32
    %111 = vector.broadcast %c4_i32 : i32 to vector<16x128xi32>
    %112 = arith.cmpi sge, %0, %111 : vector<16x128xi32>
    %c2_i32_52 = arith.constant 2 : i32
    %113 = vector.broadcast %c2_i32_52 : i32 to vector<16x128xi32>
    %114 = arith.cmpi sge, %0, %113 : vector<16x128xi32>
    %c126_i32_53 = arith.constant 126 : i32
    %115 = vector.broadcast %c126_i32_53 : i32 to vector<16x128xi32>
    %116 = arith.cmpi slt, %0, %115 : vector<16x128xi32>
    %c124_i32 = arith.constant 124 : i32
    %117 = vector.broadcast %c124_i32 : i32 to vector<16x128xi32>
    %118 = arith.cmpi slt, %0, %117 : vector<16x128xi32>
    %c1 = arith.constant 1 : index
    %c0_54 = arith.constant 0 : index
    %c0_55 = arith.constant 0 : index
    %119 = vector.load %arg2[%c1, %c0_54, %c0_55] : memref<3x16x80xbf16, #tpu.memory_space<vmem>>, vector<1x16x80xbf16>
    %120 = vector.shape_cast %119 : vector<1x16x80xbf16> to vector<16x80xbf16>
    %c1_56 = arith.constant 1 : index
    %c0_57 = arith.constant 0 : index
    %c0_58 = arith.constant 0 : index
    %121 = vector.load %arg3[%c1_56, %c0_57, %c0_58] : memref<3x16x1xf32, #tpu.memory_space<vmem>>, vector<1x16x1xf32>
    %122 = vector.shape_cast %121 : vector<1x16x1xf32> to vector<16x1xf32>
    %123 = vector.extract_strided_slice %110 {offsets = [0, 124], sizes = [16, 4], strides = [1, 1]} : vector<16x128xf32> to vector<16x4xf32>
    %124 = vector.extract_strided_slice %110 {offsets = [0, 0], sizes = [16, 124], strides = [1, 1]} : vector<16x128xf32> to vector<16x124xf32>
    %125 = tpu.concatenate %123, %124 in 1 : vector<16x4xf32>, vector<16x124xf32> -> vector<16x128xf32>
    %cst_59 = arith.constant 0.000000e+00 : f32
    %126 = vector.broadcast %cst_59 : f32 to vector<16x128xf32>
    %127 = arith.select %112, %125, %126 : vector<16x128xi1>, vector<16x128xf32>
    %128 = arith.truncf %127 : vector<16x128xf32> to vector<16x128xbf16>
    %c0_60 = arith.constant 0 : index
    %c0_61 = arith.constant 0 : index
    %129 = vector.load %arg7[%c0_60, %c0_61] : memref<80x128xbf16, #tpu.memory_space<vmem>>, vector<16x128xbf16>
    tpu.vector_store %arg7[%c0_60, %c0_61], %128 {strides = array<i32>} : memref<80x128xbf16, #tpu.memory_space<vmem>>, vector<16x128xbf16>,
    %130 = vector.extract_strided_slice %110 {offsets = [0, 126], sizes = [16, 2], strides = [1, 1]} : vector<16x128xf32> to vector<16x2xf32>
    %131 = vector.extract_strided_slice %110 {offsets = [0, 0], sizes = [16, 126], strides = [1, 1]} : vector<16x128xf32> to vector<16x126xf32>
    %132 = tpu.concatenate %130, %131 in 1 : vector<16x2xf32>, vector<16x126xf32> -> vector<16x128xf32>
    %cst_62 = arith.constant 0.000000e+00 : f32
    %133 = vector.broadcast %cst_62 : f32 to vector<16x128xf32>
    %134 = arith.select %114, %132, %133 : vector<16x128xi1>, vector<16x128xf32>
    %135 = arith.truncf %134 : vector<16x128xf32> to vector<16x128xbf16>
    %c16_63 = arith.constant 16 : index
    %c0_64 = arith.constant 0 : index
    %136 = vector.load %arg7[%c16_63, %c0_64] : memref<80x128xbf16, #tpu.memory_space<vmem>>, vector<16x128xbf16>
    tpu.vector_store %arg7[%c16_63, %c0_64], %135 {strides = array<i32>} : memref<80x128xbf16, #tpu.memory_space<vmem>>, vector<16x128xbf16>,
    %137 = arith.truncf %110 : vector<16x128xf32> to vector<16x128xbf16>
    %c32_65 = arith.constant 32 : index
    %c0_66 = arith.constant 0 : index
    %138 = vector.load %arg7[%c32_65, %c0_66] : memref<80x128xbf16, #tpu.memory_space<vmem>>, vector<16x128xbf16>
    tpu.vector_store %arg7[%c32_65, %c0_66], %137 {strides = array<i32>} : memref<80x128xbf16, #tpu.memory_space<vmem>>, vector<16x128xbf16>,
    %139 = vector.extract_strided_slice %110 {offsets = [0, 2], sizes = [16, 126], strides = [1, 1]} : vector<16x128xf32> to vector<16x126xf32>
    %140 = vector.extract_strided_slice %110 {offsets = [0, 0], sizes = [16, 2], strides = [1, 1]} : vector<16x128xf32> to vector<16x2xf32>
    %141 = tpu.concatenate %139, %140 in 1 : vector<16x126xf32>, vector<16x2xf32> -> vector<16x128xf32>
    %cst_67 = arith.constant 0.000000e+00 : f32
    %142 = vector.broadcast %cst_67 : f32 to vector<16x128xf32>
    %143 = arith.select %116, %141, %142 : vector<16x128xi1>, vector<16x128xf32>
    %144 = arith.truncf %143 : vector<16x128xf32> to vector<16x128xbf16>
    %c48_68 = arith.constant 48 : index
    %c0_69 = arith.constant 0 : index
    %145 = vector.load %arg7[%c48_68, %c0_69] : memref<80x128xbf16, #tpu.memory_space<vmem>>, vector<16x128xbf16>
    tpu.vector_store %arg7[%c48_68, %c0_69], %144 {strides = array<i32>} : memref<80x128xbf16, #tpu.memory_space<vmem>>, vector<16x128xbf16>,
    %146 = vector.extract_strided_slice %110 {offsets = [0, 4], sizes = [16, 124], strides = [1, 1]} : vector<16x128xf32> to vector<16x124xf32>
    %147 = vector.extract_strided_slice %110 {offsets = [0, 0], sizes = [16, 4], strides = [1, 1]} : vector<16x128xf32> to vector<16x4xf32>
    %148 = tpu.concatenate %146, %147 in 1 : vector<16x124xf32>, vector<16x4xf32> -> vector<16x128xf32>
    %cst_70 = arith.constant 0.000000e+00 : f32
    %149 = vector.broadcast %cst_70 : f32 to vector<16x128xf32>
    %150 = arith.select %118, %148, %149 : vector<16x128xi1>, vector<16x128xf32>
    %151 = arith.truncf %150 : vector<16x128xf32> to vector<16x128xbf16>
    %c64_71 = arith.constant 64 : index
    %c0_72 = arith.constant 0 : index
    %152 = vector.load %arg7[%c64_71, %c0_72] : memref<80x128xbf16, #tpu.memory_space<vmem>>, vector<16x128xbf16>
    tpu.vector_store %arg7[%c64_71, %c0_72], %151 {strides = array<i32>} : memref<80x128xbf16, #tpu.memory_space<vmem>>, vector<16x128xbf16>,
    %c0_73 = arith.constant 0 : index
    %c0_74 = arith.constant 0 : index
    %153 = vector.load %arg7[%c0_73, %c0_74] : memref<80x128xbf16, #tpu.memory_space<vmem>>, vector<80x128xbf16>
    %cst_75 = arith.constant dense<0.000000e+00> : vector<16x128xf32>
    %154 = tpu.matmul %120, %153, %cst_75 {dimension_numbers = #tpu.dot_dimension_numbers<[1], [0], [0], [1], [0, 0, 1, 1], [], []>} : vector<16x80xbf16>, vector<80x128xbf16>, vector<16x128xf32> -> vector<16x128xf32>
    %155 = vector.broadcast %122 : vector<16x1xf32> to vector<16x128xf32>
    %156 = arith.addf %154, %155 : vector<16x128xf32>
    %cst_76 = arith.constant 0.000000e+00 : f32
    %157 = vector.broadcast %cst_76 : f32 to vector<16x128xf32>
    %158 = arith.cmpf ogt, %156, %157 : vector<16x128xf32>
    %cst_77 = arith.constant 0.000000e+00 : f32
    %159 = vector.broadcast %cst_77 : f32 to vector<16x128xf32>
    %160 = arith.minimumf %156, %159 : vector<16x128xf32>
    %161 = math.exp %160 : vector<16x128xf32>
    %cst_78 = arith.constant 1.000000e+00 : f32
    %162 = vector.broadcast %cst_78 : f32 to vector<16x128xf32>
    %163 = arith.subf %161, %162 : vector<16x128xf32>
    %164 = arith.select %158, %156, %163 : vector<16x128xi1>, vector<16x128xf32>
    %c1_79 = arith.constant 1 : index
    %c0_80 = arith.constant 0 : index
    %c0_81 = arith.constant 0 : index
    %165 = vector.load %arg4[%c1_79, %c0_80, %c0_81] : memref<3x16x80xbf16, #tpu.memory_space<vmem>>, vector<1x16x80xbf16>
    %166 = vector.shape_cast %165 : vector<1x16x80xbf16> to vector<16x80xbf16>
    %c1_82 = arith.constant 1 : index
    %c0_83 = arith.constant 0 : index
    %c0_84 = arith.constant 0 : index
    %167 = vector.load %arg5[%c1_82, %c0_83, %c0_84] : memref<3x16x1xf32, #tpu.memory_space<vmem>>, vector<1x16x1xf32>
    %168 = vector.shape_cast %167 : vector<1x16x1xf32> to vector<16x1xf32>
    %169 = vector.extract_strided_slice %164 {offsets = [0, 124], sizes = [16, 4], strides = [1, 1]} : vector<16x128xf32> to vector<16x4xf32>
    %170 = vector.extract_strided_slice %164 {offsets = [0, 0], sizes = [16, 124], strides = [1, 1]} : vector<16x128xf32> to vector<16x124xf32>
    %171 = tpu.concatenate %169, %170 in 1 : vector<16x4xf32>, vector<16x124xf32> -> vector<16x128xf32>
    %cst_85 = arith.constant 0.000000e+00 : f32
    %172 = vector.broadcast %cst_85 : f32 to vector<16x128xf32>
    %173 = arith.select %112, %171, %172 : vector<16x128xi1>, vector<16x128xf32>
    %174 = arith.truncf %173 : vector<16x128xf32> to vector<16x128xbf16>
    %c0_86 = arith.constant 0 : index
    %c0_87 = arith.constant 0 : index
    %175 = vector.load %arg7[%c0_86, %c0_87] : memref<80x128xbf16, #tpu.memory_space<vmem>>, vector<16x128xbf16>
    tpu.vector_store %arg7[%c0_86, %c0_87], %174 {strides = array<i32>} : memref<80x128xbf16, #tpu.memory_space<vmem>>, vector<16x128xbf16>,
    %176 = vector.extract_strided_slice %164 {offsets = [0, 126], sizes = [16, 2], strides = [1, 1]} : vector<16x128xf32> to vector<16x2xf32>
    %177 = vector.extract_strided_slice %164 {offsets = [0, 0], sizes = [16, 126], strides = [1, 1]} : vector<16x128xf32> to vector<16x126xf32>
    %178 = tpu.concatenate %176, %177 in 1 : vector<16x2xf32>, vector<16x126xf32> -> vector<16x128xf32>
    %cst_88 = arith.constant 0.000000e+00 : f32
    %179 = vector.broadcast %cst_88 : f32 to vector<16x128xf32>
    %180 = arith.select %114, %178, %179 : vector<16x128xi1>, vector<16x128xf32>
    %181 = arith.truncf %180 : vector<16x128xf32> to vector<16x128xbf16>
    %c16_89 = arith.constant 16 : index
    %c0_90 = arith.constant 0 : index
    %182 = vector.load %arg7[%c16_89, %c0_90] : memref<80x128xbf16, #tpu.memory_space<vmem>>, vector<16x128xbf16>
    tpu.vector_store %arg7[%c16_89, %c0_90], %181 {strides = array<i32>} : memref<80x128xbf16, #tpu.memory_space<vmem>>, vector<16x128xbf16>,
    %183 = arith.truncf %164 : vector<16x128xf32> to vector<16x128xbf16>
    %c32_91 = arith.constant 32 : index
    %c0_92 = arith.constant 0 : index
    %184 = vector.load %arg7[%c32_91, %c0_92] : memref<80x128xbf16, #tpu.memory_space<vmem>>, vector<16x128xbf16>
    tpu.vector_store %arg7[%c32_91, %c0_92], %183 {strides = array<i32>} : memref<80x128xbf16, #tpu.memory_space<vmem>>, vector<16x128xbf16>,
    %185 = vector.extract_strided_slice %164 {offsets = [0, 2], sizes = [16, 126], strides = [1, 1]} : vector<16x128xf32> to vector<16x126xf32>
    %186 = vector.extract_strided_slice %164 {offsets = [0, 0], sizes = [16, 2], strides = [1, 1]} : vector<16x128xf32> to vector<16x2xf32>
    %187 = tpu.concatenate %185, %186 in 1 : vector<16x126xf32>, vector<16x2xf32> -> vector<16x128xf32>
    %cst_93 = arith.constant 0.000000e+00 : f32
    %188 = vector.broadcast %cst_93 : f32 to vector<16x128xf32>
    %189 = arith.select %116, %187, %188 : vector<16x128xi1>, vector<16x128xf32>
    %190 = arith.truncf %189 : vector<16x128xf32> to vector<16x128xbf16>
    %c48_94 = arith.constant 48 : index
    %c0_95 = arith.constant 0 : index
    %191 = vector.load %arg7[%c48_94, %c0_95] : memref<80x128xbf16, #tpu.memory_space<vmem>>, vector<16x128xbf16>
    tpu.vector_store %arg7[%c48_94, %c0_95], %190 {strides = array<i32>} : memref<80x128xbf16, #tpu.memory_space<vmem>>, vector<16x128xbf16>,
    %192 = vector.extract_strided_slice %164 {offsets = [0, 4], sizes = [16, 124], strides = [1, 1]} : vector<16x128xf32> to vector<16x124xf32>
    %193 = vector.extract_strided_slice %164 {offsets = [0, 0], sizes = [16, 4], strides = [1, 1]} : vector<16x128xf32> to vector<16x4xf32>
    %194 = tpu.concatenate %192, %193 in 1 : vector<16x124xf32>, vector<16x4xf32> -> vector<16x128xf32>
    %cst_96 = arith.constant 0.000000e+00 : f32
    %195 = vector.broadcast %cst_96 : f32 to vector<16x128xf32>
    %196 = arith.select %118, %194, %195 : vector<16x128xi1>, vector<16x128xf32>
    %197 = arith.truncf %196 : vector<16x128xf32> to vector<16x128xbf16>
    %c64_97 = arith.constant 64 : index
    %c0_98 = arith.constant 0 : index
    %198 = vector.load %arg7[%c64_97, %c0_98] : memref<80x128xbf16, #tpu.memory_space<vmem>>, vector<16x128xbf16>
    tpu.vector_store %arg7[%c64_97, %c0_98], %197 {strides = array<i32>} : memref<80x128xbf16, #tpu.memory_space<vmem>>, vector<16x128xbf16>,
    %c0_99 = arith.constant 0 : index
    %c0_100 = arith.constant 0 : index
    %199 = vector.load %arg7[%c0_99, %c0_100] : memref<80x128xbf16, #tpu.memory_space<vmem>>, vector<80x128xbf16>
    %cst_101 = arith.constant dense<0.000000e+00> : vector<16x128xf32>
    %200 = tpu.matmul %166, %199, %cst_101 {dimension_numbers = #tpu.dot_dimension_numbers<[1], [0], [0], [1], [0, 0, 1, 1], [], []>} : vector<16x80xbf16>, vector<80x128xbf16>, vector<16x128xf32> -> vector<16x128xf32>
    %201 = vector.broadcast %168 : vector<16x1xf32> to vector<16x128xf32>
    %202 = arith.addf %200, %201 : vector<16x128xf32>
    %cst_102 = arith.constant 0.000000e+00 : f32
    %203 = vector.broadcast %cst_102 : f32 to vector<16x128xf32>
    %204 = arith.cmpf ogt, %202, %203 : vector<16x128xf32>
    %cst_103 = arith.constant 0.000000e+00 : f32
    %205 = vector.broadcast %cst_103 : f32 to vector<16x128xf32>
    %206 = arith.minimumf %202, %205 : vector<16x128xf32>
    %207 = math.exp %206 : vector<16x128xf32>
    %cst_104 = arith.constant 1.000000e+00 : f32
    %208 = vector.broadcast %cst_104 : f32 to vector<16x128xf32>
    %209 = arith.subf %207, %208 : vector<16x128xf32>
    %210 = arith.select %204, %202, %209 : vector<16x128xi1>, vector<16x128xf32>
    %cst_105 = arith.constant 0.000000e+00 : f32
    %211 = vector.broadcast %cst_105 : f32 to vector<16x128xf32>
    %212 = arith.cmpf ogt, %210, %211 : vector<16x128xf32>
    %cst_106 = arith.constant 0.000000e+00 : f32
    %213 = vector.broadcast %cst_106 : f32 to vector<16x128xf32>
    %214 = arith.minimumf %210, %213 : vector<16x128xf32>
    %215 = math.exp %214 : vector<16x128xf32>
    %cst_107 = arith.constant 1.000000e+00 : f32
    %216 = vector.broadcast %cst_107 : f32 to vector<16x128xf32>
    %217 = arith.subf %215, %216 : vector<16x128xf32>
    %218 = arith.select %212, %210, %217 : vector<16x128xi1>, vector<16x128xf32>
    %c8_i32 = arith.constant 8 : i32
    %219 = vector.broadcast %c8_i32 : i32 to vector<16x128xi32>
    %220 = arith.cmpi sge, %0, %219 : vector<16x128xi32>
    %c4_i32_108 = arith.constant 4 : i32
    %221 = vector.broadcast %c4_i32_108 : i32 to vector<16x128xi32>
    %222 = arith.cmpi sge, %0, %221 : vector<16x128xi32>
    %c124_i32_109 = arith.constant 124 : i32
    %223 = vector.broadcast %c124_i32_109 : i32 to vector<16x128xi32>
    %224 = arith.cmpi slt, %0, %223 : vector<16x128xi32>
    %c120_i32 = arith.constant 120 : i32
    %225 = vector.broadcast %c120_i32 : i32 to vector<16x128xi32>
    %226 = arith.cmpi slt, %0, %225 : vector<16x128xi32>
    %c2 = arith.constant 2 : index
    %c0_110 = arith.constant 0 : index
    %c0_111 = arith.constant 0 : index
    %227 = vector.load %arg2[%c2, %c0_110, %c0_111] : memref<3x16x80xbf16, #tpu.memory_space<vmem>>, vector<1x16x80xbf16>
    %228 = vector.shape_cast %227 : vector<1x16x80xbf16> to vector<16x80xbf16>
    %c2_112 = arith.constant 2 : index
    %c0_113 = arith.constant 0 : index
    %c0_114 = arith.constant 0 : index
    %229 = vector.load %arg3[%c2_112, %c0_113, %c0_114] : memref<3x16x1xf32, #tpu.memory_space<vmem>>, vector<1x16x1xf32>
    %230 = vector.shape_cast %229 : vector<1x16x1xf32> to vector<16x1xf32>
    %231 = vector.extract_strided_slice %218 {offsets = [0, 120], sizes = [16, 8], strides = [1, 1]} : vector<16x128xf32> to vector<16x8xf32>
    %232 = vector.extract_strided_slice %218 {offsets = [0, 0], sizes = [16, 120], strides = [1, 1]} : vector<16x128xf32> to vector<16x120xf32>
    %233 = tpu.concatenate %231, %232 in 1 : vector<16x8xf32>, vector<16x120xf32> -> vector<16x128xf32>
    %cst_115 = arith.constant 0.000000e+00 : f32
    %234 = vector.broadcast %cst_115 : f32 to vector<16x128xf32>
    %235 = arith.select %220, %233, %234 : vector<16x128xi1>, vector<16x128xf32>
    %236 = arith.truncf %235 : vector<16x128xf32> to vector<16x128xbf16>
    %c0_116 = arith.constant 0 : index
    %c0_117 = arith.constant 0 : index
    %237 = vector.load %arg7[%c0_116, %c0_117] : memref<80x128xbf16, #tpu.memory_space<vmem>>, vector<16x128xbf16>
    tpu.vector_store %arg7[%c0_116, %c0_117], %236 {strides = array<i32>} : memref<80x128xbf16, #tpu.memory_space<vmem>>, vector<16x128xbf16>,
    %238 = vector.extract_strided_slice %218 {offsets = [0, 124], sizes = [16, 4], strides = [1, 1]} : vector<16x128xf32> to vector<16x4xf32>
    %239 = vector.extract_strided_slice %218 {offsets = [0, 0], sizes = [16, 124], strides = [1, 1]} : vector<16x128xf32> to vector<16x124xf32>
    %240 = tpu.concatenate %238, %239 in 1 : vector<16x4xf32>, vector<16x124xf32> -> vector<16x128xf32>
    %cst_118 = arith.constant 0.000000e+00 : f32
    %241 = vector.broadcast %cst_118 : f32 to vector<16x128xf32>
    %242 = arith.select %222, %240, %241 : vector<16x128xi1>, vector<16x128xf32>
    %243 = arith.truncf %242 : vector<16x128xf32> to vector<16x128xbf16>
    %c16_119 = arith.constant 16 : index
    %c0_120 = arith.constant 0 : index
    %244 = vector.load %arg7[%c16_119, %c0_120] : memref<80x128xbf16, #tpu.memory_space<vmem>>, vector<16x128xbf16>
    tpu.vector_store %arg7[%c16_119, %c0_120], %243 {strides = array<i32>} : memref<80x128xbf16, #tpu.memory_space<vmem>>, vector<16x128xbf16>,
    %245 = arith.truncf %218 : vector<16x128xf32> to vector<16x128xbf16>
    %c32_121 = arith.constant 32 : index
    %c0_122 = arith.constant 0 : index
    %246 = vector.load %arg7[%c32_121, %c0_122] : memref<80x128xbf16, #tpu.memory_space<vmem>>, vector<16x128xbf16>
    tpu.vector_store %arg7[%c32_121, %c0_122], %245 {strides = array<i32>} : memref<80x128xbf16, #tpu.memory_space<vmem>>, vector<16x128xbf16>,
    %247 = vector.extract_strided_slice %218 {offsets = [0, 4], sizes = [16, 124], strides = [1, 1]} : vector<16x128xf32> to vector<16x124xf32>
    %248 = vector.extract_strided_slice %218 {offsets = [0, 0], sizes = [16, 4], strides = [1, 1]} : vector<16x128xf32> to vector<16x4xf32>
    %249 = tpu.concatenate %247, %248 in 1 : vector<16x124xf32>, vector<16x4xf32> -> vector<16x128xf32>
    %cst_123 = arith.constant 0.000000e+00 : f32
    %250 = vector.broadcast %cst_123 : f32 to vector<16x128xf32>
    %251 = arith.select %224, %249, %250 : vector<16x128xi1>, vector<16x128xf32>
    %252 = arith.truncf %251 : vector<16x128xf32> to vector<16x128xbf16>
    %c48_124 = arith.constant 48 : index
    %c0_125 = arith.constant 0 : index
    %253 = vector.load %arg7[%c48_124, %c0_125] : memref<80x128xbf16, #tpu.memory_space<vmem>>, vector<16x128xbf16>
    tpu.vector_store %arg7[%c48_124, %c0_125], %252 {strides = array<i32>} : memref<80x128xbf16, #tpu.memory_space<vmem>>, vector<16x128xbf16>,
    %254 = vector.extract_strided_slice %218 {offsets = [0, 8], sizes = [16, 120], strides = [1, 1]} : vector<16x128xf32> to vector<16x120xf32>
    %255 = vector.extract_strided_slice %218 {offsets = [0, 0], sizes = [16, 8], strides = [1, 1]} : vector<16x128xf32> to vector<16x8xf32>
    %256 = tpu.concatenate %254, %255 in 1 : vector<16x120xf32>, vector<16x8xf32> -> vector<16x128xf32>
    %cst_126 = arith.constant 0.000000e+00 : f32
    %257 = vector.broadcast %cst_126 : f32 to vector<16x128xf32>
    %258 = arith.select %226, %256, %257 : vector<16x128xi1>, vector<16x128xf32>
    %259 = arith.truncf %258 : vector<16x128xf32> to vector<16x128xbf16>
    %c64_127 = arith.constant 64 : index
    %c0_128 = arith.constant 0 : index
    %260 = vector.load %arg7[%c64_127, %c0_128] : memref<80x128xbf16, #tpu.memory_space<vmem>>, vector<16x128xbf16>
    tpu.vector_store %arg7[%c64_127, %c0_128], %259 {strides = array<i32>} : memref<80x128xbf16, #tpu.memory_space<vmem>>, vector<16x128xbf16>,
    %c0_129 = arith.constant 0 : index
    %c0_130 = arith.constant 0 : index
    %261 = vector.load %arg7[%c0_129, %c0_130] : memref<80x128xbf16, #tpu.memory_space<vmem>>, vector<80x128xbf16>
    %cst_131 = arith.constant dense<0.000000e+00> : vector<16x128xf32>
    %262 = tpu.matmul %228, %261, %cst_131 {dimension_numbers = #tpu.dot_dimension_numbers<[1], [0], [0], [1], [0, 0, 1, 1], [], []>} : vector<16x80xbf16>, vector<80x128xbf16>, vector<16x128xf32> -> vector<16x128xf32>
    %263 = vector.broadcast %230 : vector<16x1xf32> to vector<16x128xf32>
    %264 = arith.addf %262, %263 : vector<16x128xf32>
    %cst_132 = arith.constant 0.000000e+00 : f32
    %265 = vector.broadcast %cst_132 : f32 to vector<16x128xf32>
    %266 = arith.cmpf ogt, %264, %265 : vector<16x128xf32>
    %cst_133 = arith.constant 0.000000e+00 : f32
    %267 = vector.broadcast %cst_133 : f32 to vector<16x128xf32>
    %268 = arith.minimumf %264, %267 : vector<16x128xf32>
    %269 = math.exp %268 : vector<16x128xf32>
    %cst_134 = arith.constant 1.000000e+00 : f32
    %270 = vector.broadcast %cst_134 : f32 to vector<16x128xf32>
    %271 = arith.subf %269, %270 : vector<16x128xf32>
    %272 = arith.select %266, %264, %271 : vector<16x128xi1>, vector<16x128xf32>
    %c2_135 = arith.constant 2 : index
    %c0_136 = arith.constant 0 : index
    %c0_137 = arith.constant 0 : index
    %273 = vector.load %arg4[%c2_135, %c0_136, %c0_137] : memref<3x16x80xbf16, #tpu.memory_space<vmem>>, vector<1x16x80xbf16>
    %274 = vector.shape_cast %273 : vector<1x16x80xbf16> to vector<16x80xbf16>
    %c2_138 = arith.constant 2 : index
    %c0_139 = arith.constant 0 : index
    %c0_140 = arith.constant 0 : index
    %275 = vector.load %arg5[%c2_138, %c0_139, %c0_140] : memref<3x16x1xf32, #tpu.memory_space<vmem>>, vector<1x16x1xf32>
    %276 = vector.shape_cast %275 : vector<1x16x1xf32> to vector<16x1xf32>
    %277 = vector.extract_strided_slice %272 {offsets = [0, 120], sizes = [16, 8], strides = [1, 1]} : vector<16x128xf32> to vector<16x8xf32>
    %278 = vector.extract_strided_slice %272 {offsets = [0, 0], sizes = [16, 120], strides = [1, 1]} : vector<16x128xf32> to vector<16x120xf32>
    %279 = tpu.concatenate %277, %278 in 1 : vector<16x8xf32>, vector<16x120xf32> -> vector<16x128xf32>
    %cst_141 = arith.constant 0.000000e+00 : f32
    %280 = vector.broadcast %cst_141 : f32 to vector<16x128xf32>
    %281 = arith.select %220, %279, %280 : vector<16x128xi1>, vector<16x128xf32>
    %282 = arith.truncf %281 : vector<16x128xf32> to vector<16x128xbf16>
    %c0_142 = arith.constant 0 : index
    %c0_143 = arith.constant 0 : index
    %283 = vector.load %arg7[%c0_142, %c0_143] : memref<80x128xbf16, #tpu.memory_space<vmem>>, vector<16x128xbf16>
    tpu.vector_store %arg7[%c0_142, %c0_143], %282 {strides = array<i32>} : memref<80x128xbf16, #tpu.memory_space<vmem>>, vector<16x128xbf16>,
    %284 = vector.extract_strided_slice %272 {offsets = [0, 124], sizes = [16, 4], strides = [1, 1]} : vector<16x128xf32> to vector<16x4xf32>
    %285 = vector.extract_strided_slice %272 {offsets = [0, 0], sizes = [16, 124], strides = [1, 1]} : vector<16x128xf32> to vector<16x124xf32>
    %286 = tpu.concatenate %284, %285 in 1 : vector<16x4xf32>, vector<16x124xf32> -> vector<16x128xf32>
    %cst_144 = arith.constant 0.000000e+00 : f32
    %287 = vector.broadcast %cst_144 : f32 to vector<16x128xf32>
    %288 = arith.select %222, %286, %287 : vector<16x128xi1>, vector<16x128xf32>
    %289 = arith.truncf %288 : vector<16x128xf32> to vector<16x128xbf16>
    %c16_145 = arith.constant 16 : index
    %c0_146 = arith.constant 0 : index
    %290 = vector.load %arg7[%c16_145, %c0_146] : memref<80x128xbf16, #tpu.memory_space<vmem>>, vector<16x128xbf16>
    tpu.vector_store %arg7[%c16_145, %c0_146], %289 {strides = array<i32>} : memref<80x128xbf16, #tpu.memory_space<vmem>>, vector<16x128xbf16>,
    %291 = arith.truncf %272 : vector<16x128xf32> to vector<16x128xbf16>
    %c32_147 = arith.constant 32 : index
    %c0_148 = arith.constant 0 : index
    %292 = vector.load %arg7[%c32_147, %c0_148] : memref<80x128xbf16, #tpu.memory_space<vmem>>, vector<16x128xbf16>
    tpu.vector_store %arg7[%c32_147, %c0_148], %291 {strides = array<i32>} : memref<80x128xbf16, #tpu.memory_space<vmem>>, vector<16x128xbf16>,
    %293 = vector.extract_strided_slice %272 {offsets = [0, 4], sizes = [16, 124], strides = [1, 1]} : vector<16x128xf32> to vector<16x124xf32>
    %294 = vector.extract_strided_slice %272 {offsets = [0, 0], sizes = [16, 4], strides = [1, 1]} : vector<16x128xf32> to vector<16x4xf32>
    %295 = tpu.concatenate %293, %294 in 1 : vector<16x124xf32>, vector<16x4xf32> -> vector<16x128xf32>
    %cst_149 = arith.constant 0.000000e+00 : f32
    %296 = vector.broadcast %cst_149 : f32 to vector<16x128xf32>
    %297 = arith.select %224, %295, %296 : vector<16x128xi1>, vector<16x128xf32>
    %298 = arith.truncf %297 : vector<16x128xf32> to vector<16x128xbf16>
    %c48_150 = arith.constant 48 : index
    %c0_151 = arith.constant 0 : index
    %299 = vector.load %arg7[%c48_150, %c0_151] : memref<80x128xbf16, #tpu.memory_space<vmem>>, vector<16x128xbf16>
    tpu.vector_store %arg7[%c48_150, %c0_151], %298 {strides = array<i32>} : memref<80x128xbf16, #tpu.memory_space<vmem>>, vector<16x128xbf16>,
    %300 = vector.extract_strided_slice %272 {offsets = [0, 8], sizes = [16, 120], strides = [1, 1]} : vector<16x128xf32> to vector<16x120xf32>
    %301 = vector.extract_strided_slice %272 {offsets = [0, 0], sizes = [16, 8], strides = [1, 1]} : vector<16x128xf32> to vector<16x8xf32>
    %302 = tpu.concatenate %300, %301 in 1 : vector<16x120xf32>, vector<16x8xf32> -> vector<16x128xf32>
    %cst_152 = arith.constant 0.000000e+00 : f32
    %303 = vector.broadcast %cst_152 : f32 to vector<16x128xf32>
    %304 = arith.select %226, %302, %303 : vector<16x128xi1>, vector<16x128xf32>
    %305 = arith.truncf %304 : vector<16x128xf32> to vector<16x128xbf16>
    %c64_153 = arith.constant 64 : index
    %c0_154 = arith.constant 0 : index
    %306 = vector.load %arg7[%c64_153, %c0_154] : memref<80x128xbf16, #tpu.memory_space<vmem>>, vector<16x128xbf16>
    tpu.vector_store %arg7[%c64_153, %c0_154], %305 {strides = array<i32>} : memref<80x128xbf16, #tpu.memory_space<vmem>>, vector<16x128xbf16>,
    %c0_155 = arith.constant 0 : index
    %c0_156 = arith.constant 0 : index
    %307 = vector.load %arg7[%c0_155, %c0_156] : memref<80x128xbf16, #tpu.memory_space<vmem>>, vector<80x128xbf16>
    %cst_157 = arith.constant dense<0.000000e+00> : vector<16x128xf32>
    %308 = tpu.matmul %274, %307, %cst_157 {dimension_numbers = #tpu.dot_dimension_numbers<[1], [0], [0], [1], [0, 0, 1, 1], [], []>} : vector<16x80xbf16>, vector<80x128xbf16>, vector<16x128xf32> -> vector<16x128xf32>
    %309 = vector.broadcast %276 : vector<16x1xf32> to vector<16x128xf32>
    %310 = arith.addf %308, %309 : vector<16x128xf32>
    %cst_158 = arith.constant 0.000000e+00 : f32
    %311 = vector.broadcast %cst_158 : f32 to vector<16x128xf32>
    %312 = arith.cmpf ogt, %310, %311 : vector<16x128xf32>
    %cst_159 = arith.constant 0.000000e+00 : f32
    %313 = vector.broadcast %cst_159 : f32 to vector<16x128xf32>
    %314 = arith.minimumf %310, %313 : vector<16x128xf32>
    %315 = math.exp %314 : vector<16x128xf32>
    %cst_160 = arith.constant 1.000000e+00 : f32
    %316 = vector.broadcast %cst_160 : f32 to vector<16x128xf32>
    %317 = arith.subf %315, %316 : vector<16x128xf32>
    %318 = arith.select %312, %310, %317 : vector<16x128xi1>, vector<16x128xf32>
    %cst_161 = arith.constant 0.000000e+00 : f32
    %319 = vector.broadcast %cst_161 : f32 to vector<16x128xf32>
    %320 = arith.cmpf ogt, %318, %319 : vector<16x128xf32>
    %cst_162 = arith.constant 0.000000e+00 : f32
    %321 = vector.broadcast %cst_162 : f32 to vector<16x128xf32>
    %322 = arith.minimumf %318, %321 : vector<16x128xf32>
    %323 = math.exp %322 : vector<16x128xf32>
    %cst_163 = arith.constant 1.000000e+00 : f32
    %324 = vector.broadcast %cst_163 : f32 to vector<16x128xf32>
    %325 = arith.subf %323, %324 : vector<16x128xf32>
    %326 = arith.select %320, %318, %325 : vector<16x128xi1>, vector<16x128xf32>
    %c0_164 = arith.constant 0 : index
    %c0_165 = arith.constant 0 : index
    %c0_166 = arith.constant 0 : index
    %327 = vector.load %arg6[%c0_164, %c0_165, %c0_166] : memref<1x16x128xf32, #tpu.memory_space<vmem>>, vector<1x16x128xf32>
    %328 = vector.shape_cast %327 : vector<1x16x128xf32> to vector<16x128xf32>
    %329 = vector.shape_cast %326 : vector<16x128xf32> to vector<1x16x128xf32>
    tpu.vector_store %arg6[%c0_164, %c0_165, %c0_166], %329 {strides = array<i32>} : memref<1x16x128xf32, #tpu.memory_space<vmem>>, vector<1x16x128xf32>,
    return
  }
  func.func @transform_0(%arg0: i32) -> (i32, i32, i32) {
    %c0_i32 = arith.constant 0 : i32
    %c0_i32_0 = arith.constant 0 : i32
    %c0_i32_1 = arith.constant 0 : i32
    return %arg0, %c0_i32, %c0_i32_0 : i32, i32, i32
  }
  func.func @transform_1(%arg0: i32) -> (i32, i32, i32) {
    %c0_i32 = arith.constant 0 : i32
    %c0_i32_0 = arith.constant 0 : i32
    %c0_i32_1 = arith.constant 0 : i32
    %c0_i32_2 = arith.constant 0 : i32
    return %c0_i32, %c0_i32_0, %c0_i32_1 : i32, i32, i32
  }
  func.func @transform_2(%arg0: i32) -> (i32, i32, i32) {
    %c0_i32 = arith.constant 0 : i32
    %c0_i32_0 = arith.constant 0 : i32
    %c0_i32_1 = arith.constant 0 : i32
    %c0_i32_2 = arith.constant 0 : i32
    return %c0_i32, %c0_i32_0, %c0_i32_1 : i32, i32, i32
  }
  func.func @transform_3(%arg0: i32) -> (i32, i32, i32) {
    %c0_i32 = arith.constant 0 : i32
    %c0_i32_0 = arith.constant 0 : i32
    %c0_i32_1 = arith.constant 0 : i32
    %c0_i32_2 = arith.constant 0 : i32
    return %c0_i32, %c0_i32_0, %c0_i32_1 : i32, i32, i32
  }
  func.func @transform_4(%arg0: i32) -> (i32, i32, i32) {
    %c0_i32 = arith.constant 0 : i32
    %c0_i32_0 = arith.constant 0 : i32
    %c0_i32_1 = arith.constant 0 : i32
    %c0_i32_2 = arith.constant 0 : i32
    return %c0_i32, %c0_i32_0, %c0_i32_1 : i32, i32, i32
  }
  func.func @transform_5(%arg0: i32) -> (i32, i32, i32) {
    %c0_i32 = arith.constant 0 : i32
    %c0_i32_0 = arith.constant 0 : i32
    %c0_i32_1 = arith.constant 0 : i32
    return %arg0, %c0_i32, %c0_i32_0 : i32, i32, i32
  }
}

</mosaic_0001>

<bundles_post_ra>
// kernel: run.1
= control target key start
LH: loop header
LB: loop body
LE: loop exit
PB: predicated region body
PF: predicated region fallthrough
CT: control target
= control target key end

     0   :  { %10 = vsyncpa [#allocation4], 0  ;;  %s1997_s0 = inlined_call_operand.vmem [shape: f32[2,16,128], index: 0, kind: input, shape index: {}]   ;;  %s1998_s1 = inlined_call_operand.vmem [shape: bf16[3,16,80], index: 1, kind: input, shape index: {}]   ;;  %s1999_s2 = inlined_call_operand.vmem [shape: f32[3,16,1], index: 2, kind: input, shape index: {}]   ;;  %s2000_s3 = inlined_call_operand.vmem [shape: bf16[3,16,80], index: 3, kind: input, shape index: {}]   ;;  %s2001_s4 = inlined_call_operand.vmem [shape: f32[3,16,1], index: 4, kind: input, shape index: {}]   ;;  %s2002_s5 = inlined_call_operand.hbm [shape: f32[2,16,128], index: 5, kind: output, shape index: {}]  }
   0x1   :  { %12 = vsyncpa [#allocation4 + $0x1], 0  ;;  %s1677_s18 = smov 0   ;;  %s1679_s19 = smov 0  }
   0x2   :  { %s1681_s20 = smov 0   ;;  %s1683_s21 = smov 0  }
   0x3 LB: > { %s1698_s22 = sadd.s32 4294967295, %s1632_s21   ;;  %s1103_s23 = sadd.s32 4294967294, %s1632_s21   ;;  %s1632_s21 = sphi %s1683_s21, %s2024_s21   ;;  %s1628_s20 = sphi %s1681_s20, %s2023_s20   ;;  %s1624_s19 = sphi %s1679_s19, %s2022_s19   ;;  %s1620_s18 = sphi %s1677_s18, %s2021_s18  }
   0x4   : > { %s1702_s24 = sadd.s32 1, %s1632_s21   ;;  %s135_s25 = sadd.s32 1, %s1628_s20 }
   0x5   : > { %s132_s26 = ssub.s32 %s1632_s21, %s1702_s24  ;;  %p145_p0 = scmp.ne.s32.totalorder %s1628_s20, %s1624_s19 }
   0x6   : > { %p133_p1 = scmp.eq.s32.totalorder %s132_s26, 0  ;;  %p146_p2 = scmp.eq.s32.totalorder %s1698_s22, 1 }
   0x7   : > { %p151_p3 = scmp.ne.s32.totalorder %s1624_s19, %s1620_s18  ;;  %p152_p4 = scmp.eq.s32.totalorder %s1103_s23, 1 }
   0x8   : > { %s1713_s27 = scalar_select %p133_p1, %s1628_s20, %s135_s25  }
   0x9   : > { %p1715_p5 = por %p146_p2, %p145_p0  ;;  %p1719_p6 = por %p152_p4, %p151_p3 }
   0xa   : > { %p1106_p7 = scmp.ge.s32.totalorder %s1632_s21, 1  ;;  %p190_p8 = scmp.lt.s32.totalorder %s1632_s21, 3 }
   0xc   : > { %p191_p9 = pnand %p1106_p7, %p190_p8 }
   0xd   : > { %p218_p10 = scmp.lt.s32.totalorder (!%p191_p9), %s1698_s22, 1  ;;  %v1634_v0 = vmov (!%p191_p9), 0.0   ;;  %s1635_s10 = smov (!%p191_p9), 2   ;;  %vm1639_vm0 = vmmov (!%p191_p9), 0   ;;  %v234_v5 = vld [vmem:[%s1999_s2] sm:$0xff] (!%p191_p9)  ;;  %v235_v6 = vld [vmem:[%s1999_s2 + $0x8] sm:$0xff] (!%p191_p9)  ;;  %v224_v8 = vlaneseq (!%p191_p9) }
   0xe   : > { %194 = sbr.rel (%p191_p9) target bundleno = 2339 (0x923), region = 40  ;;  %1271 = vmatprep.subr.bf16.mxu0 (!%p191_p9), %v1634_v0  ;;  %1285 = vmatprep.subr.bf16.mxu1 (!%p191_p9), %v1634_v0  ;;  %s1636_s11 = smov (!%p191_p9), 127   ;;  %v1640_v7 = vmov (!%p191_p9), 0   ;;  %v1528_v30 = vld [vmem:[%s1998_s1] sm:$0xff] (!%p191_p9)   ;;  %vm300_vm9 = vcmask (!%p191_p9), 654336   ;;  %v360_v51 = vld [vmem:[%s2001_s4 + $0x8] sm:$0xff] (!%p191_p9) }
   0xf   : > { %s1637_s12 = smov (!%p191_p9), 1   ;;  %s1638_s13 = smov (!%p191_p9), 126   ;;  %1281 = vmatprep.mubr.msk.bf16.mxu0 (!%p191_p9), %vm1639_vm0, %v1634_v0  ;;  %1295 = vmatprep.mubr.msk.bf16.mxu1 (!%p191_p9), %vm1639_vm0, %v1634_v0  ;;  %v1746_v9 = vand.u32 (!%p191_p9), 127, %v224_v8  ;;  %v359_v52 = vld [vmem:[%s2001_s4] sm:$0xff] (!%p191_p9)  ;;  %v1531_v13 = vld [vmem:[%s2000_s3 + $0x8] sm:$0xff] (!%p191_p9)  }
  0x10   : > { %1426 = vset.pattern.permute.xlu0 (!%p191_p9), %v1640_v7  ;;  %1427 = vset.pattern.permute.xlu1 (!%p191_p9), %v1640_v7  ;;  %s1643_s8 = smov (!%p191_p9), 8   ;;  %s1645_s26 = smov (!%p191_p9), [#allocation3]  }
  0x11   : > { %vm228_vm1 = vcmp.ge.s32.totalorder (!%p191_p9), %v1746_v9, 2  ;;  %vm229_vm3 = vcmp.ge.s32.totalorder (!%p191_p9), %v1746_v9, 1  ;;  %vm230_vm5 = vcmp.lt.s32.totalorder (!%p191_p9), %v1746_v9, 127  ;;  %vm231_vm7 = vcmp.lt.s32.totalorder (!%p191_p9), %v1746_v9, 126 }
  0x12   : > { %vm1749_vm2 = vmpackc.low (!%p191_p9), %vm228_vm1, %vm228_vm1  ;;  %vm493_vm1 = vcmp.ge.s32.totalorder (!%p191_p9), %v1746_v9, 4 }
  0x13   : > { %vm1757_vm4 = vmpackc.low (!%p191_p9), %vm229_vm3, %vm229_vm3 }
  0x14   : > { %vm1766_vm6 = vmpackc.low (!%p191_p9), %vm230_vm5, %vm230_vm5 }
  0x15   : > { %s219_s30 = scalar_select %p218_p10, %s1698_s22, 1  ;;  %vm1774_vm8 = vmpackc.low %vm231_vm7, %vm231_vm7 }
  0x16   : > { %vm1827_vm3 = vmpackc.low %vm493_vm1, %vm493_vm1 }
  0x17   : > { %s1161_s6 = sshll.u32 %s219_s30, 4  ;;  %s1574_s30 = sshll.u32 %s1645_s26, 4  ;;  %s1575_s30 = int_to_ptr.vmem [resolvable:$false] %s1574_s30 }
  0x18   : > { %s222_s9 = scalar_lea.vmem %s1997_s0, %s1161_s6  ;;  %s1576_s6 = scalar_lea.vmem %s1575_s30, 512 }
  0x19   : > { %v226_v1 = vld [vmem:[%s222_s9] sm:$0xff]  ;;  %v227_v2 = vld [vmem:[%s222_s9 + $0x8] sm:$0xff]  ;;  %s1644_s9 = smov 120  }
  0x1a   : > { %v1406_v3 = vpack.i.bf16 %v227_v2, %v226_v1  ;;  %v258_v4 = vpack.c.bf16 %v227_v2, %v226_v1 }
  0x1c   : > { %1407 = vrot.lane.b32.xlu0 %v1406_v3, %s1635_s10  ;;  %1417 = vrot.lane.b32.xlu1 %v1406_v3, %s1636_s11 }
  0x20   : > { %1412 = vrot.lane.b32.xlu0 %v1406_v3, %s1637_s12  ;;  %1422 = vrot.lane.b32.xlu1 %v1406_v3, %s1638_s13 }
  0x24   : > { %287 = vperm.xlu0 %1426, %v234_v5   ;;  %292 = vperm.xlu1 %1427, %v235_v6   ;;  %v1529_v6 = vld [vmem:[%s2000_s3] sm:$0xff]  }
  0x8e   : > { %v1408_v10 = vpop.permute.xlu0 %1407  ;;  %v1418_v16 = vpop.permute.xlu1 %1417 }
  0x8f   : > { %v1410_v11 = vunpack.i.h.bf16 %v1408_v10  ;;  %v1409_v12 = vunpack.i.l.bf16 %v1408_v10  ;;  %v1420_v21 = vunpack.i.h.bf16 %v1418_v16  ;;  %v1419_v22 = vunpack.i.l.bf16 %v1418_v16 }
  0x91   : > { %v1164_v14 = vpack.c.bf16 %v1410_v11, %v1409_v12  ;;  %v1170_v24 = vpack.c.bf16 %v1420_v21, %v1419_v22 }
  0x92   : > { %v1413_v15 = vpop.permute.xlu0 %1412  ;;  %v1423_v23 = vpop.permute.xlu1 %1422 }
  0x93   : > { %v1415_v17 = vunpack.i.h.bf16 %v1413_v15  ;;  %v1414_v18 = vunpack.i.l.bf16 %v1413_v15  ;;  %1272 = vmatpush3.bf16.msk.msra.mxu0 %vm1749_vm2, %v1164_v14  ;;  %v1425_v25 = vunpack.i.h.bf16 %v1423_v23  ;;  %v1424_v26 = vunpack.i.l.bf16 %v1423_v23 }
  0x94   : > { %1273 = vmatprep.subr.bf16.mxu0 %v1634_v0 }
  0x95   : > { %v1167_v20 = vpack.c.bf16 %v1415_v17, %v1414_v18  ;;  %v1173_v28 = vpack.c.bf16 %v1425_v25, %v1424_v26 }
  0x97   : > { %1274 = vmatpush3.bf16.msk.msra.mxu0 %vm1757_vm4, %v1167_v20 }
  0x98   : > { %1275 = vmatprep.subr.bf16.mxu0 %v1634_v0 }
  0x9b   : > { %1276 = vmatpush3.bf16.msra.mxu0 %v258_v4 }
  0x9c   : > { %1277 = vmatprep.subr.bf16.mxu0 %v1634_v0 }
  0x9f   : > { %1278 = vmatpush3.bf16.msk.msra.mxu0 %vm1766_vm6, %v1170_v24 }
  0xa0   : > { %1279 = vmatprep.subr.bf16.mxu0 %v1634_v0 }
  0xa3   : > { %1280 = vmatpush3.bf16.msk.msra.mxu0 %vm1774_vm8, %v1173_v28  ;;  %v288_v31 = vpop.permute.xlu0 %287  ;;  %v293_v33 = vpop.permute.xlu1 %292 }
  0xa4   : > { %1299 = vmatprep.subr.bf16.mxu0 %v1634_v0 }
  0xa6   : > { %1282 = vmatmul.mubr.msk.bf16.vlgmr.msra.gmra.mrb[0].mxu0 %vm300_vm9, %v1528_v30 }
  0xa7   : > { %1309 = vmatprep.mubr.msk.bf16.mxu0 %vm1639_vm0, %v1634_v0 }
 0x179   : > { %v338_v32 = vpop.f32.mrb[0].mxu0 }
 0x17a   : > { %v339_v34 = vadd.f32 %v338_v32, %v288_v31  ;;  %v1283_v35 = vpop.f32.mrb[1].mxu0 }
 0x17b   : > { %v341_v36 = vpop.f32.mrb[2].mxu0 }
 0x17c   : > { %v347_v37 = vmin.f32 %v339_v34, 0.0  ;;  %v342_v38 = vadd.f32 %v341_v36, %v293_v33  ;;  %v1284_v39 = vpop.f32.mrb[3].mxu0  ;;  %vm345_vm10 = vcmp.gt.f32.partialorder %v339_v34, 0.0 }
 0x17e   : > { %v349_v40 = vmul.f32 1.442695, %v347_v37  ;;  %v348_v41 = vmin.f32 %v342_v38, 0.0  ;;  %vm346_vm11 = vcmp.gt.f32.partialorder %v342_v38, 0.0 }
 0x180   : > { %1534 = vpow2.f32 %v349_v40  ;;  %v351_v42 = vmul.f32 1.442695, %v348_v41  ;;  %v1123_v40 = vld [vmem:[%s1999_s2 + $0x18] sm:$0xff]  ;;  %v1122_v41 = vld [vmem:[%s1999_s2 + $0x10] sm:$0xff] }
 0x182   : > { %1536 = vpow2.f32 %v351_v42 }
 0x18a   : > { %v1535_v43 = vpop.eup %1534 }
 0x18b   : > { %v1112_v44 = vadd.f32 -1.0, %v1535_v43 }
 0x18c   : > { %v1537_v45 = vpop.eup %1536 }
 0x18d   : > { %v1113_v46 = vadd.f32 -1.0, %v1537_v45  ;;  %v355_v47 = vsel %vm345_vm10, %v339_v34, %v1112_v44 }
 0x18f   : > { %v356_v48 = vsel %vm346_vm11, %v342_v38, %v1113_v46  ;;  %vm759_vm11 = vcmp.ge.s32.totalorder %v1746_v9, 8  ;;  %v1533_v46 = vld [vmem:[%s2000_s3 + $0x10] sm:$0xff]  }
 0x190   : > { %v1433_v49 = vpack.i.bf16 %v356_v48, %v355_v47  ;;  %v383_v50 = vpack.c.bf16 %v356_v48, %v355_v47 }
 0x192   : > { %1434 = vrot.lane.b32.xlu0 %v1433_v49, %s1637_s12  ;;  %1429 = vrot.lane.b32.xlu1 %v1433_v49, %s1635_s10  ;;  %s1642_s12 = smov 124  }
 0x196   : > { %1444 = vrot.lane.b32.xlu0 %v1433_v49, %s1638_s13  ;;  %1439 = vrot.lane.b32.xlu1 %v1433_v49, %s1636_s11  ;;  %s1641_s11 = smov 4  }
 0x19a   : > { %417 = vperm.xlu0 %1426, %v360_v51   ;;  %412 = vperm.xlu1 %1427, %v359_v52  }
 0x204   : > { %v1435_v53 = vpop.permute.xlu0 %1434  ;;  %v1430_v54 = vpop.permute.xlu1 %1429 }
 0x205   : > { %v1432_v55 = vunpack.i.h.bf16 %v1430_v54  ;;  %v1431_v56 = vunpack.i.l.bf16 %v1430_v54  ;;  %v1437_v57 = vunpack.i.h.bf16 %v1435_v53  ;;  %v1436_v58 = vunpack.i.l.bf16 %v1435_v53 }
 0x207   : > { %v1176_v59 = vpack.c.bf16 %v1432_v55, %v1431_v56  ;;  %v1179_v60 = vpack.c.bf16 %v1437_v57, %v1436_v58 }
 0x208   : > { %v1440_v61 = vpop.permute.xlu1 %1439  ;;  %v1445_v1 = vpop.permute.xlu0 %1444 }
 0x209   : > { %1286 = vmatpush3.bf16.msk.msra.mxu1 %vm1749_vm2, %v1176_v59  ;;  %v1442_v62 = vunpack.i.h.bf16 %v1440_v61  ;;  %v1441_v63 = vunpack.i.l.bf16 %v1440_v61  ;;  %v1447_v2 = vunpack.i.h.bf16 %v1445_v1  ;;  %v1446_v3 = vunpack.i.l.bf16 %v1445_v1 }
 0x20a   : > { %1287 = vmatprep.subr.bf16.mxu1 %v1634_v0 }
 0x20b   : > { %v1182_v4 = vpack.c.bf16 %v1442_v62, %v1441_v63  ;;  %v1185_v5 = vpack.c.bf16 %v1447_v2, %v1446_v3 }
 0x20d   : > { %1288 = vmatpush3.bf16.msk.msra.mxu1 %vm1757_vm4, %v1179_v60  ;;  %vm494_vm4 = vcmp.lt.s32.totalorder %v1746_v9, 124  ;;  %v1530_v60 = vld [vmem:[%s1998_s1 + $0x8] sm:$0xff]  }
 0x20e   : > { %1289 = vmatprep.subr.bf16.mxu1 %v1634_v0  ;;  %vm1842_vm5 = vmpackc.low %vm494_vm4, %vm494_vm4 }
 0x211   : > { %1290 = vmatpush3.bf16.msra.mxu1 %v383_v50 }
 0x212   : > { %1291 = vmatprep.subr.bf16.mxu1 %v1634_v0 }
 0x215   : > { %1292 = vmatpush3.bf16.msk.msra.mxu1 %vm1766_vm6, %v1182_v4 }
 0x216   : > { %1293 = vmatprep.subr.bf16.mxu1 %v1634_v0 }
 0x219   : > { %1294 = vmatpush3.bf16.msk.msra.mxu1 %vm1774_vm8, %v1185_v5  ;;  %v413_v7 = vpop.permute.xlu1 %412  ;;  %v418_v12 = vpop.permute.xlu0 %417 }
 0x21a   : > { %1313 = vmatprep.subr.bf16.mxu1 %v1634_v0 }
 0x21c   : > { %1296 = vmatmul.mubr.msk.bf16.vlgmr.msra.gmra.mrb[0].mxu1 %vm300_vm9, %v1529_v6 }
 0x21d   : > { %1323 = vmatprep.mubr.msk.bf16.mxu1 %vm1639_vm0, %v1634_v0 }
 0x2ef   : > { %v462_v8 = vpop.f32.mrb[0].mxu1 }
 0x2f0   : > { %v463_v10 = vadd.f32 %v462_v8, %v413_v7  ;;  %v1297_v11 = vpop.f32.mrb[1].mxu1 }
 0x2f1   : > { %v465_v14 = vpop.f32.mrb[2].mxu1 }
 0x2f2   : > { %v471_v15 = vmin.f32 %v463_v10, 0.0  ;;  %v466_v16 = vadd.f32 %v465_v14, %v418_v12  ;;  %v1298_v17 = vpop.f32.mrb[3].mxu1  ;;  %vm469_vm12 = vcmp.gt.f32.partialorder %v463_v10, 0.0 }
 0x2f4   : > { %v473_v18 = vmul.f32 1.442695, %v471_v15  ;;  %v472_v19 = vmin.f32 %v466_v16, 0.0  ;;  %vm470_vm13 = vcmp.gt.f32.partialorder %v466_v16, 0.0 }
 0x2f6   : > { %1538 = vpow2.f32 %v473_v18  ;;  %v475_v20 = vmul.f32 1.442695, %v472_v19 }
 0x2f8   : > { %1540 = vpow2.f32 %v475_v20  ;;  %v1131_v20 = vld [vmem:[%s2001_s4 + $0x18] sm:$0xff] }
 0x300   : > { %v1539_v21 = vpop.eup %1538 }
 0x301   : > { %v1116_v22 = vadd.f32 -1.0, %v1539_v21  ;;  %v1130_v21 = vld [vmem:[%s2001_s4 + $0x10] sm:$0xff] }
 0x302   : > { %v1541_v23 = vpop.eup %1540 }
 0x303   : > { %v479_v24 = vsel %vm469_vm12, %v463_v10, %v1116_v22  ;;  %v1117_v25 = vadd.f32 -1.0, %v1541_v23  ;;  %vm1895_vm12 = vmpackc.low %vm759_vm11, %vm759_vm11 }
 0x304   : > { %v483_v26 = vmin.f32 %v479_v24, 0.0  ;;  %vm481_vm14 = vcmp.gt.f32.partialorder %v479_v24, 0.0 }
 0x305   : > { %v480_v27 = vsel %vm470_vm13, %v466_v16, %v1117_v25  ;;  %vm760_vm13 = vcmp.lt.s32.totalorder %v1746_v9, 120 }
 0x306   : > { %v485_v28 = vmul.f32 1.442695, %v483_v26  ;;  %v484_v30 = vmin.f32 %v480_v27, 0.0  ;;  %vm482_vm15 = vcmp.gt.f32.partialorder %v480_v27, 0.0 }
 0x308   : > { %1542 = vpow2.f32 %v485_v28  ;;  %v487_v31 = vmul.f32 1.442695, %v484_v30 }
 0x30a   : > { %1544 = vpow2.f32 %v487_v31 }
 0x312   : > { %v1543_v32 = vpop.eup %1542 }
 0x313   : > { %v1118_v33 = vadd.f32 -1.0, %v1543_v32 }
 0x314   : > { %v1545_v34 = vpop.eup %1544 }
 0x315   : > { %v1119_v35 = vadd.f32 -1.0, %v1545_v34  ;;  %v491_v36 = vsel %vm481_vm14, %v479_v24, %v1118_v33  ;;  %vm1910_vm14 = vmpackc.low %vm760_vm13, %vm760_vm13 }
 0x317   : > { %v492_v37 = vsel %vm482_vm15, %v480_v27, %v1119_v35 }
 0x318   : > { %v1453_v38 = vpack.i.bf16 %v492_v37, %v491_v36  ;;  %v523_v39 = vpack.c.bf16 %v492_v37, %v491_v36 }
 0x31a   : > { %1454 = vrot.lane.b32.xlu0 %v1453_v38, %s1635_s10  ;;  %1449 = vrot.lane.b32.xlu1 %v1453_v38, %s1641_s11 }
 0x31e   : > { %1464 = vrot.lane.b32.xlu0 %v1453_v38, %s1642_s12  ;;  %1459 = vrot.lane.b32.xlu1 %v1453_v38, %s1638_s13 }
 0x322   : > { %557 = vperm.xlu0 %1426, %v1123_v40   ;;  %552 = vperm.xlu1 %1427, %v1122_v41  }
 0x38c   : > { %v1455_v42 = vpop.permute.xlu0 %1454  ;;  %v1450_v43 = vpop.permute.xlu1 %1449 }
 0x38d   : > { %v1452_v44 = vunpack.i.h.bf16 %v1450_v43  ;;  %v1451_v45 = vunpack.i.l.bf16 %v1450_v43  ;;  %v1457_v47 = vunpack.i.h.bf16 %v1455_v42  ;;  %v1456_v48 = vunpack.i.l.bf16 %v1455_v42 }
 0x38f   : > { %v1188_v49 = vpack.c.bf16 %v1452_v44, %v1451_v45  ;;  %v1191_v50 = vpack.c.bf16 %v1457_v47, %v1456_v48 }
 0x390   : > { %v1460_v51 = vpop.permute.xlu1 %1459  ;;  %v1465_v54 = vpop.permute.xlu0 %1464 }
 0x391   : > { %1300 = vmatpush3.bf16.msk.msra.mxu0 %vm1827_vm3, %v1188_v49  ;;  %v1462_v52 = vunpack.i.h.bf16 %v1460_v51  ;;  %v1461_v53 = vunpack.i.l.bf16 %v1460_v51  ;;  %v1467_v55 = vunpack.i.h.bf16 %v1465_v54  ;;  %v1466_v56 = vunpack.i.l.bf16 %v1465_v54 }
 0x392   : > { %1301 = vmatprep.subr.bf16.mxu0 %v1634_v0 }
 0x393   : > { %v1194_v57 = vpack.c.bf16 %v1462_v52, %v1461_v53  ;;  %v1197_v59 = vpack.c.bf16 %v1467_v55, %v1466_v56 }
 0x395   : > { %1302 = vmatpush3.bf16.msk.msra.mxu0 %vm1749_vm2, %v1191_v50 }
 0x396   : > { %1303 = vmatprep.subr.bf16.mxu0 %v1634_v0 }
 0x399   : > { %1304 = vmatpush3.bf16.msra.mxu0 %v523_v39 }
 0x39a   : > { %1305 = vmatprep.subr.bf16.mxu0 %v1634_v0 }
 0x39d   : > { %1306 = vmatpush3.bf16.msk.msra.mxu0 %vm1774_vm8, %v1194_v57 }
 0x39e   : > { %1307 = vmatprep.subr.bf16.mxu0 %v1634_v0 }
 0x3a1   : > { %1308 = vmatpush3.bf16.msk.msra.mxu0 %vm1842_vm5, %v1197_v59  ;;  %v553_v61 = vpop.permute.xlu1 %552  ;;  %v558_v2 = vpop.permute.xlu0 %557 }
 0x3a2   : > { %1327 = vmatprep.subr.bf16.mxu0 %v1634_v0 }
 0x3a4   : > { %1310 = vmatmul.mubr.msk.bf16.vlgmr.msra.gmra.mrb[4].mxu0 %vm300_vm9, %v1530_v60 }
 0x3a5   : > { %1337 = vmatprep.mubr.msk.bf16.mxu0 %vm1639_vm0, %v1634_v0 }
 0x477   : > { %v602_v62 = vpop.f32.mrb[4].mxu0 }
 0x478   : > { %v603_v63 = vadd.f32 %v602_v62, %v553_v61  ;;  %v1311_v1 = vpop.f32.mrb[5].mxu0 }
 0x479   : > { %v605_v3 = vpop.f32.mrb[6].mxu0 }
 0x47a   : > { %v611_v4 = vmin.f32 %v603_v63, 0.0  ;;  %v606_v5 = vadd.f32 %v605_v3, %v558_v2  ;;  %v1312_v6 = vpop.f32.mrb[7].mxu0  ;;  %vm609_vm6 = vcmp.gt.f32.partialorder %v603_v63, 0.0 }
 0x47c   : > { %v613_v7 = vmul.f32 1.442695, %v611_v4  ;;  %v612_v8 = vmin.f32 %v606_v5, 0.0  ;;  %vm610_vm7 = vcmp.gt.f32.partialorder %v606_v5, 0.0 }
 0x47e   : > { %1546 = vpow2.f32 %v613_v7  ;;  %v615_v10 = vmul.f32 1.442695, %v612_v8  ;;  %v1141_v7 = vld [vmem:[%s1999_s2 + $0x28] sm:$0xff]  ;;  %v1140_v8 = vld [vmem:[%s1999_s2 + $0x20] sm:$0xff] }
 0x480   : > { %1548 = vpow2.f32 %v615_v10 }
 0x488   : > { %v1547_v11 = vpop.eup %1546 }
 0x489   : > { %v1126_v12 = vadd.f32 -1.0, %v1547_v11 }
 0x48a   : > { %v1549_v14 = vpop.eup %1548 }
 0x48b   : > { %v1127_v15 = vadd.f32 -1.0, %v1549_v14  ;;  %v619_v16 = vsel %vm609_vm6, %v603_v63, %v1126_v12 }
 0x48d   : > { %v620_v17 = vsel %vm610_vm7, %v606_v5, %v1127_v15 }
 0x48e   : > { %v1473_v18 = vpack.i.bf16 %v620_v17, %v619_v16  ;;  %v649_v19 = vpack.c.bf16 %v620_v17, %v619_v16 }
 0x490   : > { %1474 = vrot.lane.b32.xlu0 %v1473_v18, %s1635_s10  ;;  %1469 = vrot.lane.b32.xlu1 %v1473_v18, %s1641_s11  ;;  %s215_s10 = sand.u32 1, %s1624_s19  }
 0x494   : > { %1484 = vrot.lane.b32.xlu0 %v1473_v18, %s1642_s12  ;;  %1479 = vrot.lane.b32.xlu1 %v1473_v18, %s1638_s13  ;;  %s1107_s13 = sshll.u32 %s215_s10, 4 }
 0x495   : > { %s217_s14 = scalar_lea.vmem [#allocation3], %s1107_s13 }
 0x496   : > { %s1041_s15 = sshll.u32 %s217_s14, 4  ;;  %s1953_s15 = int_to_ptr.vmem [resolvable:$true] %s1041_s15 }
 0x497   : > { %s1570_s25 = scalar_lea.vmem %s1953_s15, 256  ;;  %p1577_p0 = scmp.lt.s32.totalorder %s1953_s15, %s1575_s30 }
 0x498   : > { %683 = vperm.xlu0 %1426, %v1131_v20   ;;  %678 = vperm.xlu1 %1427, %v1130_v21   ;;  %p1571_p11 = scmp.ne.s32.totalorder %s1953_s15, %s1570_s25  ;;  %p1578_p1 = scmp.lt.s32.totalorder %s1576_s6, %s1570_s25 }
 0x49a   : > { %p1572_p12 = pnand %p1571_p11, %p1715_p5  ;;  %p1579_p2 = por %p1578_p1, %p1577_p0 }
 0x49c   : > { %p1573_p13 = pneg %p1572_p12 }
 0x49e   : > { %p1580_p3 = pnand %p1579_p2, %p1573_p13 }
 0x502   : > { %v1475_v22 = vpop.permute.xlu0 %1474  ;;  %v1470_v23 = vpop.permute.xlu1 %1469 }
 0x503   : > { %v1472_v24 = vunpack.i.h.bf16 %v1470_v23  ;;  %v1471_v25 = vunpack.i.l.bf16 %v1470_v23  ;;  %v1477_v26 = vunpack.i.h.bf16 %v1475_v22  ;;  %v1476_v27 = vunpack.i.l.bf16 %v1475_v22 }
 0x505   : > { %v1200_v28 = vpack.c.bf16 %v1472_v24, %v1471_v25  ;;  %v1203_v30 = vpack.c.bf16 %v1477_v26, %v1476_v27 }
 0x506   : > { %v1480_v31 = vpop.permute.xlu1 %1479  ;;  %v1485_v34 = vpop.permute.xlu0 %1484 }
 0x507   : > { %1314 = vmatpush3.bf16.msk.msra.mxu1 %vm1827_vm3, %v1200_v28  ;;  %v1482_v32 = vunpack.i.h.bf16 %v1480_v31  ;;  %v1481_v33 = vunpack.i.l.bf16 %v1480_v31  ;;  %v1487_v35 = vunpack.i.h.bf16 %v1485_v34  ;;  %v1486_v36 = vunpack.i.l.bf16 %v1485_v34 }
 0x508   : > { %1315 = vmatprep.subr.bf16.mxu1 %v1634_v0 }
 0x509   : > { %v1206_v37 = vpack.c.bf16 %v1482_v32, %v1481_v33  ;;  %v1209_v38 = vpack.c.bf16 %v1487_v35, %v1486_v36 }
 0x50b   : > { %1316 = vmatpush3.bf16.msk.msra.mxu1 %vm1749_vm2, %v1203_v30  ;;  %v1532_v30 = vld [vmem:[%s1998_s1 + $0x10] sm:$0xff]  }
 0x50c   : > { %1317 = vmatprep.subr.bf16.mxu1 %v1634_v0 }
 0x50f   : > { %1318 = vmatpush3.bf16.msra.mxu1 %v649_v19 }
 0x510   : > { %1319 = vmatprep.subr.bf16.mxu1 %v1634_v0 }
 0x513   : > { %1320 = vmatpush3.bf16.msk.msra.mxu1 %vm1774_vm8, %v1206_v37 }
 0x514   : > { %1321 = vmatprep.subr.bf16.mxu1 %v1634_v0 }
 0x517   : > { %1322 = vmatpush3.bf16.msk.msra.mxu1 %vm1842_vm5, %v1209_v38  ;;  %v679_v39 = vpop.permute.xlu1 %678  ;;  %v684_v42 = vpop.permute.xlu0 %683 }
 0x518   : > { %1341 = vmatprep.subr.bf16.mxu1 %v1634_v0 }
 0x51a   : > { %1324 = vmatmul.mubr.msk.bf16.vlgmr.msra.gmra.mrb[4].mxu1 %vm300_vm9, %v1531_v13 }
 0x51b   : > { %1351 = vmatprep.mubr.msk.bf16.mxu1 %vm1639_vm0, %v1634_v0 }
 0x5ed   : > { %v728_v29 = vpop.f32.mrb[4].mxu1 }
 0x5ee   : > { %v729_v40 = vadd.f32 %v728_v29, %v679_v39  ;;  %v1325_v41 = vpop.f32.mrb[5].mxu1 }
 0x5ef   : > { %v731_v43 = vpop.f32.mrb[6].mxu1 }
 0x5f0   : > { %v737_v44 = vmin.f32 %v729_v40, 0.0  ;;  %v732_v45 = vadd.f32 %v731_v43, %v684_v42  ;;  %v1326_v47 = vpop.f32.mrb[7].mxu1  ;;  %vm735_vm2 = vcmp.gt.f32.partialorder %v729_v40, 0.0 }
 0x5f2   : > { %v739_v48 = vmul.f32 1.442695, %v737_v44  ;;  %v738_v49 = vmin.f32 %v732_v45, 0.0  ;;  %vm736_vm0 = vcmp.gt.f32.partialorder %v732_v45, 0.0 }
 0x5f4   : > { %1550 = vpow2.f32 %v739_v48  ;;  %v741_v50 = vmul.f32 1.442695, %v738_v49  ;;  %v1149_v49 = vld [vmem:[%s2001_s4 + $0x28] sm:$0xff] }
 0x5f6   : > { %1552 = vpow2.f32 %v741_v50  ;;  %v1148_v50 = vld [vmem:[%s2001_s4 + $0x20] sm:$0xff] }
 0x5fe   : > { %v1551_v51 = vpop.eup %1550 }
 0x5ff   : > { %v1134_v52 = vadd.f32 -1.0, %v1551_v51 }
 0x600   : > { %v1553_v53 = vpop.eup %1552 }
 0x601   : > { %v745_v54 = vsel %vm735_vm2, %v729_v40, %v1134_v52  ;;  %v1135_v55 = vadd.f32 -1.0, %v1553_v53 }
 0x602   : > { %v749_v56 = vmin.f32 %v745_v54, 0.0  ;;  %vm747_vm8 = vcmp.gt.f32.partialorder %v745_v54, 0.0 }
 0x603   : > { %v746_v57 = vsel %vm736_vm0, %v732_v45, %v1135_v55 }
 0x604   : > { %v751_v59 = vmul.f32 1.442695, %v749_v56  ;;  %v750_v60 = vmin.f32 %v746_v57, 0.0  ;;  %vm748_vm10 = vcmp.gt.f32.partialorder %v746_v57, 0.0 }
 0x606   : > { %1554 = vpow2.f32 %v751_v59  ;;  %v753_v61 = vmul.f32 1.442695, %v750_v60 }
 0x608   : > { %1556 = vpow2.f32 %v753_v61 }
 0x610   : > { %v1555_v62 = vpop.eup %1554 }
 0x611   : > { %v1136_v63 = vadd.f32 -1.0, %v1555_v62 }
 0x612   : > { %v1557_v1 = vpop.eup %1556 }
 0x613   : > { %v1137_v2 = vadd.f32 -1.0, %v1557_v1  ;;  %v757_v3 = vsel %vm747_vm8, %v745_v54, %v1136_v63 }
 0x615   : > { %v758_v4 = vsel %vm748_vm10, %v746_v57, %v1137_v2 }
 0x616   : > { %v1493_v5 = vpack.i.bf16 %v758_v4, %v757_v3  ;;  %v789_v6 = vpack.c.bf16 %v758_v4, %v757_v3 }
 0x618   : > { %1494 = vrot.lane.b32.xlu0 %v1493_v5, %s1641_s11  ;;  %1489 = vrot.lane.b32.xlu1 %v1493_v5, %s1643_s8 }
 0x61c   : > { %1504 = vrot.lane.b32.xlu0 %v1493_v5, %s1644_s9  ;;  %1499 = vrot.lane.b32.xlu1 %v1493_v5, %s1642_s12 }
 0x620   : > { %823 = vperm.xlu0 %1426, %v1141_v7   ;;  %818 = vperm.xlu1 %1427, %v1140_v8  }
 0x68a   : > { %v1495_v10 = vpop.permute.xlu0 %1494  ;;  %v1490_v11 = vpop.permute.xlu1 %1489 }
 0x68b   : > { %v1492_v12 = vunpack.i.h.bf16 %v1490_v11  ;;  %v1491_v14 = vunpack.i.l.bf16 %v1490_v11  ;;  %v1497_v16 = vunpack.i.h.bf16 %v1495_v10  ;;  %v1496_v17 = vunpack.i.l.bf16 %v1495_v10 }
 0x68d   : > { %v1212_v18 = vpack.c.bf16 %v1492_v12, %v1491_v14  ;;  %v1215_v19 = vpack.c.bf16 %v1497_v16, %v1496_v17 }
 0x68e   : > { %v1500_v20 = vpop.permute.xlu1 %1499  ;;  %v1505_v23 = vpop.permute.xlu0 %1504 }
 0x68f   : > { %1328 = vmatpush3.bf16.msk.msra.mxu0 %vm1895_vm12, %v1212_v18  ;;  %v1502_v21 = vunpack.i.h.bf16 %v1500_v20  ;;  %v1501_v22 = vunpack.i.l.bf16 %v1500_v20  ;;  %v1507_v24 = vunpack.i.h.bf16 %v1505_v23  ;;  %v1506_v25 = vunpack.i.l.bf16 %v1505_v23 }
 0x690   : > { %1329 = vmatprep.subr.bf16.mxu0 %v1634_v0 }
 0x691   : > { %v1218_v26 = vpack.c.bf16 %v1502_v21, %v1501_v22  ;;  %v1221_v28 = vpack.c.bf16 %v1507_v24, %v1506_v25 }
 0x693   : > { %1330 = vmatpush3.bf16.msk.msra.mxu0 %vm1827_vm3, %v1215_v19 }
 0x694   : > { %1331 = vmatprep.subr.bf16.mxu0 %v1634_v0 }
 0x697   : > { %1332 = vmatpush3.bf16.msra.mxu0 %v789_v6 }
 0x698   : > { %1333 = vmatprep.subr.bf16.mxu0 %v1634_v0 }
 0x69b   : > { %1334 = vmatpush3.bf16.msk.msra.mxu0 %vm1842_vm5, %v1218_v26 }
 0x69c   : > { %1335 = vmatprep.subr.bf16.mxu0 %v1634_v0 }
 0x69f   : > { %1336 = vmatpush3.bf16.msk.msra.mxu0 %vm1910_vm14, %v1221_v28  ;;  %v819_v9 = vpop.permute.xlu1 %818  ;;  %v824_v34 = vpop.permute.xlu0 %823 }
 0x6a2   : > { %1338 = vmatmul.mubr.msk.bf16.vlgmr.msra.gmra.mrb[8].mxu0 %vm300_vm9, %v1532_v30 }
 0x775   : > { %v868_v31 = vpop.f32.mrb[8].mxu0 }
 0x776   : > { %v869_v32 = vadd.f32 %v868_v31, %v819_v9  ;;  %v1339_v33 = vpop.f32.mrb[9].mxu0 }
 0x777   : > { %v871_v35 = vpop.f32.mrb[10].mxu0 }
 0x778   : > { %v877_v36 = vmin.f32 %v869_v32, 0.0  ;;  %v872_v37 = vadd.f32 %v871_v35, %v824_v34  ;;  %v1340_v38 = vpop.f32.mrb[11].mxu0  ;;  %vm875_vm15 = vcmp.gt.f32.partialorder %v869_v32, 0.0 }
 0x77a   : > { %v879_v13 = vmul.f32 1.442695, %v877_v36  ;;  %v878_v39 = vmin.f32 %v872_v37, 0.0  ;;  %vm876_vm1 = vcmp.gt.f32.partialorder %v872_v37, 0.0 }
 0x77c   : > { %1558 = vpow2.f32 %v879_v13  ;;  %v881_v29 = vmul.f32 1.442695, %v878_v39 }
 0x77e   : > { %1560 = vpow2.f32 %v881_v29 }
 0x786   : > { %v1559_v40 = vpop.eup %1558 }
 0x787   : > { %v1144_v41 = vadd.f32 -1.0, %v1559_v40 }
 0x788   : > { %v1561_v42 = vpop.eup %1560 }
 0x789   : > { %v1145_v43 = vadd.f32 -1.0, %v1561_v42  ;;  %v885_v44 = vsel %vm875_vm15, %v869_v32, %v1144_v41 }
 0x78b   : > { %v886_v45 = vsel %vm876_vm1, %v872_v37, %v1145_v43 }
 0x78c   : > { %v1513_v47 = vpack.i.bf16 %v886_v45, %v885_v44  ;;  %v915_v48 = vpack.c.bf16 %v886_v45, %v885_v44 }
 0x78e   : > { %1514 = vrot.lane.b32.xlu0 %v1513_v47, %s1641_s11  ;;  %1509 = vrot.lane.b32.xlu1 %v1513_v47, %s1643_s8 }
 0x792   : > { %1524 = vrot.lane.b32.xlu0 %v1513_v47, %s1644_s9  ;;  %1519 = vrot.lane.b32.xlu1 %v1513_v47, %s1642_s12  ;;  %s1162_s9 = sshll.u32 %s1698_s22, 8  ;;  %s1955_s22 = scalar_lea.sflag [#allocation4], %s215_s10 }
 0x793   : > { %s1951_s23 = scalar_lea.hbm %s2002_s5, %s1162_s9 }
 0x796   : > { %949 = vperm.xlu0 %1426, %v1149_v49   ;;  %944 = vperm.xlu1 %1427, %v1148_v50  }
 0x800   : > { %v1515_v51 = vpop.permute.xlu0 %1514  ;;  %v1510_v52 = vpop.permute.xlu1 %1509 }
 0x801   : > { %v1512_v53 = vunpack.i.h.bf16 %v1510_v52  ;;  %v1511_v54 = vunpack.i.l.bf16 %v1510_v52  ;;  %v1517_v55 = vunpack.i.h.bf16 %v1515_v51  ;;  %v1516_v56 = vunpack.i.l.bf16 %v1515_v51 }
 0x803   : > { %v1224_v57 = vpack.c.bf16 %v1512_v53, %v1511_v54  ;;  %v1227_v59 = vpack.c.bf16 %v1517_v55, %v1516_v56 }
 0x804   : > { %v1520_v60 = vpop.permute.xlu1 %1519  ;;  %v1525_v63 = vpop.permute.xlu0 %1524 }
 0x805   : > { %1342 = vmatpush3.bf16.msk.msra.mxu1 %vm1895_vm12, %v1224_v57  ;;  %v1522_v61 = vunpack.i.h.bf16 %v1520_v60  ;;  %v1521_v62 = vunpack.i.l.bf16 %v1520_v60  ;;  %v1527_v1 = vunpack.i.h.bf16 %v1525_v63  ;;  %v1526_v2 = vunpack.i.l.bf16 %v1525_v63 }
 0x806   : > { %1343 = vmatprep.subr.bf16.mxu1 %v1634_v0 }
 0x807   : > { %v1230_v3 = vpack.c.bf16 %v1522_v61, %v1521_v62  ;;  %v1233_v4 = vpack.c.bf16 %v1527_v1, %v1526_v2 }
 0x809   : > { %1344 = vmatpush3.bf16.msk.msra.mxu1 %vm1827_vm3, %v1227_v59 }
 0x80a   : > { %1345 = vmatprep.subr.bf16.mxu1 %v1634_v0 }
 0x80d   : > { %1346 = vmatpush3.bf16.msra.mxu1 %v915_v48 }
 0x80e   : > { %1347 = vmatprep.subr.bf16.mxu1 %v1634_v0 }
 0x811   : > { %1348 = vmatpush3.bf16.msk.msra.mxu1 %vm1842_vm5, %v1230_v3 }
 0x812   : > { %1349 = vmatprep.subr.bf16.mxu1 %v1634_v0 }
 0x815   : > { %1350 = vmatpush3.bf16.msk.msra.mxu1 %vm1910_vm14, %v1233_v4  ;;  %v945_v5 = vpop.permute.xlu1 %944  ;;  %v950_v10 = vpop.permute.xlu0 %949 }
 0x818   : > { %1352 = vmatmul.mubr.msk.bf16.vlgmr.msra.gmra.mrb[8].mxu1 %vm300_vm9, %v1533_v46 }
 0x8eb   : > { %v994_v6 = vpop.f32.mrb[8].mxu1 }
 0x8ec   : > { %v995_v7 = vadd.f32 %v994_v6, %v945_v5  ;;  %v1353_v8 = vpop.f32.mrb[9].mxu1 }
 0x8ed   : > { %v997_v11 = vpop.f32.mrb[10].mxu1 }
 0x8ee   : > { %v1003_v58 = vmin.f32 %v995_v7, 0.0  ;;  %v998_v12 = vadd.f32 %v997_v11, %v950_v10  ;;  %v1354_v14 = vpop.f32.mrb[11].mxu1  ;;  %vm1001_vm9 = vcmp.gt.f32.partialorder %v995_v7, 0.0 }
 0x8f0   : > { %v1005_v0 = vmul.f32 1.442695, %v1003_v58  ;;  %v1004_v15 = vmin.f32 %v998_v12, 0.0  ;;  %vm1002_vm3 = vcmp.gt.f32.partialorder %v998_v12, 0.0 }
 0x8f2   : > { %1562 = vpow2.f32 %v1005_v0  ;;  %v1007_v16 = vmul.f32 1.442695, %v1004_v15 }
 0x8f4   : > { %1564 = vpow2.f32 %v1007_v16 }
 0x8fc   : > { %v1563_v17 = vpop.eup %1562 }
 0x8fd   : > { %v1152_v18 = vadd.f32 -1.0, %v1563_v17 }
 0x8fe   : > { %v1565_v19 = vpop.eup %1564 }
 0x8ff   : > { %v1011_v20 = vsel %vm1001_vm9, %v995_v7, %v1152_v18  ;;  %v1153_v21 = vadd.f32 -1.0, %v1565_v19 }
 0x900   : > { %v1015_v22 = vmin.f32 %v1011_v20, 0.0  ;;  %vm1013_vm4 = vcmp.gt.f32.partialorder %v1011_v20, 0.0 }
 0x901   : > { %v1012_v23 = vsel %vm1002_vm3, %v998_v12, %v1153_v21 }
 0x902   : > { %v1017_v24 = vmul.f32 1.442695, %v1015_v22  ;;  %v1016_v25 = vmin.f32 %v1012_v23, 0.0  ;;  %vm1014_vm5 = vcmp.gt.f32.partialorder %v1012_v23, 0.0 }
 0x904   : > { %1566 = vpow2.f32 %v1017_v24  ;;  %v1019_v26 = vmul.f32 1.442695, %v1016_v25 }
 0x906   : > { %1568 = vpow2.f32 %v1019_v26 }
 0x90e   : > { %v1567_v27 = vpop.eup %1566 }
 0x90f   : > { %v1154_v28 = vadd.f32 -1.0, %v1567_v27 }
 0x910   : > { %v1569_v30 = vpop.eup %1568 }
 0x911   : > { %v1023_v9 = vsel %vm1013_vm4, %v1011_v20, %v1154_v28  ;;  %v1155_v31 = vadd.f32 -1.0, %v1569_v30 }
 0x912   : > { %1025 = vst [vmem:[%s217_s14] sm:$0xff] %v1023_v9 }
 0x913   : > { %v1024_v32 = vsel %vm1014_vm5, %v1012_v23, %v1155_v31 }
 0x914   : > { %1026 = vst [vmem:[%s217_s14 + $0x8] sm:$0xff] %v1024_v32 }
 0x915   : > { %1583 = shalt.err (!%p1580_p3)
}
 0x916   : > { %s1584_s7 = scalar_lea.hbm %s1951_s23, 256  ;;  %s1588_s10 = scalar_lea.hbm %s2002_s5, 512 }
 0x917   : > { %p1585_p4 = scmp.ne.s32.totalorder %s1951_s23, %s1584_s7  ;;  %p1589_p9 = scmp.lt.u32.totalorder %s1951_s23, %s2002_s5 }
 0x918   : > { %p1590_p10 = scmp.lt.u32.totalorder %s1588_s10, %s1584_s7  ;;  %p1592_p12 = scmp.lt.u32.totalorder %s1584_s7, %s1951_s23 }
 0x919   : > { %p1586_p7 = pnand %p1585_p4, %p1715_p5 }
 0x91a   : > { %p1591_p11 = por %p1590_p10, %p1589_p9 }
 0x91b   : > { %p1587_p8 = pneg %p1586_p7 }
 0x91c   : > { %p1593_p13 = por %p1592_p12, %p1591_p11 }
 0x91e   : > { %p1594_p0 = pnand %p1593_p13, %p1587_p8 }
 0x920   : > { %1597 = shalt.err (!%p1594_p0)
}
 0x921   : > { %s1646_s14 = smov 128  }
 0x922   : > { %1355 = dma.vmem_to_hbm [thread:$0]  (%p1715_p5), %s1953_s15, 256, %s1951_s23, %s1955_s22, %s1646_s14, %s1646_s14, %s1643_s8  }
 0x923 PF: > { %p1361_p1 = scmp.ge.s32.totalorder %s1632_s21, 2  ;;  %s1056_s16 = sand.u32 1, %s1620_s18  }
 0x924   : > { %s1057_s17 = scalar_lea.sflag [#allocation4], %s1056_s16 }
 0x925   : > { %p1358_p2 = pnand %p1361_p1, %p1719_p6 }
 0x927   : > { %1615 = dma.done.wait (!%p1358_p2), %s1057_s17, 256  }
 0x928   : > { %1617 = vsyncadd (!%p1358_p2), %s1057_s17, 4294967040  ;;  %p15_p3 = scmp.ge.s32.totalorder %s1702_s24, 4   ;;  %s2021_s18 = smov %s1624_s19 }
 0x929   : > { %s2022_s19 = smov %s1628_s20  ;;  %s2023_s20 = smov %s1713_s27 }
 0x92a   : > { %s2024_s21 = smov %s1702_s24  ;;  %17 = sbr.rel (!%p15_p3) target bundleno = 3 (0x3), region = 83 }
 0x931   :  { %1062 = vsyncpa [#allocation4], 1 }
 0x932   :  { %1064 = vsyncpa [#allocation4 + $0x1], 1 }

</bundles_post_ra>
